<compile_context>
chip_gen: v7x
topology: tpu7x:2x2x1
jax: 0.10.0
libtpu: 0.0.40
codegen_flags: <defaults>
</compile_context>

<pallas_src>
import functools
import math

import jax
import jax.numpy as jnp
from jax.experimental import pallas as pl
from jax.experimental.pallas import tpu as pltpu


def _attention_kernel(qcols_ref, ref_ref, wr_ref, br_ref, v_ref,
                      e_ref, logits_ref, *, tb, d, use_tanh, C, dyn_loop):
    # qcols_ref:  (TB, D, 1)   projected queries, one column per batch element
    # ref_ref:    (TL, TB*D)   encoder states, native (L,B,D) layout, minor
    #                          dims merged (free reshape in the wrapper)
    # wr_ref:     (D, D)       Conv1d(k=1) weight, PyTorch (out, in) layout
    # br_ref:     (D, 1)       Conv1d bias as a column
    # v_ref:      (D, 1)       attention vector as a column
    # e_ref:      (TB, D, TL)  conv output, PyTorch (B, D, L) layout
    # logits_ref: (TB, 1, TL)
    wr = wr_ref[...]
    br = br_ref[...]
    v_col = v_ref[...]

    def per_batch(b, off):
        # rows of batch element b: (TL, D) lane slice of the merged block
        r_b = ref_ref[:, pl.ds(off, d)]
        # Conv1d(k=1): e_b[o, l] = sum_k Wr[o, k] * ref[l, b, k]  -> (D, TL).
        # A @ B^T-style contraction keeps both MXU operands in their natural
        # lane layout and writes e directly in (D, L) order.
        e_b = jax.lax.dot_general(
            wr, r_b, (((1,), (1,)), ((), ())),
            preferred_element_type=jnp.float32) + br
        e_ref[b] = e_b.astype(e_ref.dtype)

        # u[l] = v . tanh(q_proj + e[:, l]) : VPU multiply + XLU sublane
        # reduce (avoids TB separate M=1 MXU matmuls).
        t_b = jnp.tanh(e_b + qcols_ref[b])                      # (D, TL)
        u_b = jnp.sum(v_col * t_b, axis=0, keepdims=True)       # (1, TL)
        if use_tanh:
            u_b = C * jnp.tanh(u_b)
        logits_ref[b] = u_b.astype(logits_ref.dtype)

    if dyn_loop:
        # Real in-kernel loop: bounds the live ranges of e_b / t_b
        # (each D*TL f32) and keeps the instruction stream small.
        @pl.loop(0, tb)
        def _(b):
            per_batch(b, pl.multiple_of(b * d, 128))
    else:
        # Static unroll fallback (D not lane-aligned, or dynamic-slice
        # lowering unavailable on this backend).
        for b in range(tb):
            per_batch(b, b * d)


def _vmem_capacity_bytes():
    try:
        return int(pltpu.get_tpu_info().vmem_capacity_bytes)
    except Exception:
        return 64 * 1024 * 1024          # conservative: v7x per-TC VMEM


def _lcm(a, b):
    return a * b // math.gcd(a, b)


def _plan_tiles(B, D, L, itemsize=4):
    """Returns (TB, Bp, TL, Lp, vmem_limit_bytes)."""
    big_vmem = _vmem_capacity_bytes() >= 128 * 1024 * 1024
    # Budget for the double-buffered ref-input + e-output blocks (the two
    # HBM-heavy streams).  v7x has only 64 MiB VMEM per TensorCore -> stay
    # near the 32 MiB scoped limit; v5e/v6e (128 MiB) can take ~2x.
    ws_budget = (40 if big_vmem else 20) * 1024 * 1024
    vmem_limit = (64 if big_vmem else 32) * 1024 * 1024

    # Batch tile: smallest TB with TB % 8 == 0 and (TB*D) % 128 == 0 so the
    # merged ref block and the logits block are always legally tileable.
    tb_pref = _lcm(8, 128 // math.gcd(D, 128))
    if B % tb_pref == 0:
        TB, Bp = tb_pref, B
    elif B <= 64 and 2 * 2 * B * D * 128 * itemsize <= ws_budget:
        TB, Bp = B, B                    # small/awkward batch: one whole tile
    else:
        # TODO(synk): for D with few factors of 2 this pads up to tb_pref=128;
        # acceptable (<2x) but a transposed-q layout would avoid it.
        TB = tb_pref
        Bp = -(-B // TB) * TB            # pad the batch, outputs sliced back

    # L tile: largest power-of-two tile fitting the working-set budget.
    per_tl = 2 * 2 * TB * D * itemsize   # ref + e blocks, double-buffered
    tl_cap = max(128, ws_budget // per_tl)
    cands = [c for c in (4096, 2048, 1024, 512, 256, 128) if c <= tl_cap]
    if L <= cands[0]:
        TL, Lp = L, L
        # Keep both v7x TensorCores busy: avoid a 1-step grid when L splits
        # evenly into >= 2 aligned tiles.
        if Bp == TB and L >= 256 and L % 256 == 0:
            TL = L // 2
    else:
        TL = None
        for c in cands:                  # prefer a tile that divides L exactly
            if L % c == 0:
                TL = c
                break
        if TL is None:
            TL = cands[-1]               # minimise L padding (<= 127 rows)
        Lp = -(-L // TL) * TL
    return TB, Bp, TL, Lp, vmem_limit


def attention_forward(query, ref, wq, bq, wr, br, v, *, use_tanh=False, C=10.0,
                      force_static=False):
    """query: (B, D); ref: (L, B, D)  [PyTorch convention].
    Returns (e, logits) with e: (B, D, L), logits: (B, L)  [PyTorch shapes]."""
    B, D = query.shape
    L = ref.shape[0]
    assert ref.shape == (L, B, D)

    TB, Bp, TL, Lp, vmem_limit = _plan_tiles(B, D, L)
    n_bt, n_lt = Bp // TB, Lp // TL

    # Hoist the query projection: one fused XLA GEMM for the whole batch.
    q_proj = (query @ wq.T + bq).astype(jnp.float32)             # (B, D)
    if Bp != B:
        q_proj = jnp.pad(q_proj, ((0, Bp - B), (0, 0)))
        ref = jnp.pad(ref, ((0, 0), (0, Bp - B), (0, 0)))
    if Lp != L:
        ref = jnp.pad(ref, ((0, Lp - L), (0, 0), (0, 0)))

    qcols = q_proj.reshape(Bp, D, 1)           # free reshape: column per batch
    ref2 = ref.reshape(Lp, Bp * D)             # free row-major reshape
    br_col = br[:, None].astype(jnp.float32)   # (D, 1)
    v_col = v[:, None].astype(jnp.float32)     # (D, 1)

    def call(dyn_loop):
        kernel = functools.partial(_attention_kernel, tb=TB, d=D,
                                   use_tanh=use_tanh, C=float(C),
                                   dyn_loop=dyn_loop)
        return pl.pallas_call(
            kernel,
            out_shape=(
                jax.ShapeDtypeStruct((Bp, D, Lp), jnp.float32),   # e
                jax.ShapeDtypeStruct((Bp, 1, Lp), jnp.float32),   # logits
            ),
            grid_spec=pltpu.PrefetchScalarGridSpec(
                num_scalar_prefetch=0,
                grid=(n_bt, n_lt),
                in_specs=[
                    pl.BlockSpec((TB, D, 1), lambda bt, lt: (bt, 0, 0)),   # q cols
                    pl.BlockSpec((TL, TB * D), lambda bt, lt: (lt, bt)),   # ref
                    pl.BlockSpec((D, D), lambda bt, lt: (0, 0)),           # Wr
                    pl.BlockSpec((D, 1), lambda bt, lt: (0, 0)),           # br
                    pl.BlockSpec((D, 1), lambda bt, lt: (0, 0)),           # v
                ],
                out_specs=[
                    pl.BlockSpec((TB, D, TL), lambda bt, lt: (bt, 0, lt)),  # e
                    pl.BlockSpec((TB, 1, TL), lambda bt, lt: (bt, 0, lt)),  # logits
                ],
            ),
            compiler_params=pltpu.CompilerParams(
                dimension_semantics=("parallel", "parallel"),
                vmem_limit_bytes=vmem_limit),
        )(qcols, ref2, wr, br_col, v_col)

    use_dyn = (D % 128 == 0) and TB > 1 and not force_static
    if use_dyn:
        try:
            e_p, logits_p = call(True)
        except Exception:
            # Dynamic lane-slice loop failed to lower on this backend; the
            # fully static unroll computes the same thing.
            e_p, logits_p = call(False)
    else:
        e_p, logits_p = call(False)

    e_out = e_p if (Bp == B and Lp == L) else e_p[:B, :, :L]
    logits_out = logits_p.reshape(Bp, Lp)
    if Bp != B or Lp != L:
        logits_out = logits_out[:B, :L]
    return e_out, logits_out


def _reference_forward(query, ref, wq, bq, wr, br, v, *, use_tanh=False, C=10.0):
    """Pure-JAX reference mirroring the PyTorch code."""
    ref_bdl = jnp.transpose(ref, (1, 2, 0))                      # (B, D, L)
    q = query @ wq.T + bq                                        # (B, D)
    e = jnp.einsum('od,bdl->bol', wr, ref_bdl,
                   precision=jax.lax.Precision.HIGHEST) + br[None, :, None]
    t = jnp.tanh(q[:, :, None] + e)                              # (B, D, L)
    u = jnp.einsum('d,bdl->bl', v, t,
                   precision=jax.lax.Precision.HIGHEST)          # (B, L)
    logits = C * jnp.tanh(u) if use_tanh else u
    return e, logits


if __name__ == "__main__":
    root = jax.random.PRNGKey(0)

    def run_case(case_idx, batch, dim, sourceL, use_tanh, C, force_static=False):
        key = jax.random.fold_in(root, case_idx)
        k_q, k_r, k_wq, k_bq, k_wr, k_br, k_v = jax.random.split(key, 7)

        bound = 1.0 / math.sqrt(dim)
        wq = jax.random.uniform(k_wq, (dim, dim), jnp.float32, -bound, bound)
        bq = jax.random.uniform(k_bq, (dim,), jnp.float32, -bound, bound)
        wr = jax.random.uniform(k_wr, (dim, dim), jnp.float32, -bound, bound)
        br = jax.random.uniform(k_br, (dim,), jnp.float32, -bound, bound)
        v = jax.random.uniform(k_v, (dim,), jnp.float32, -bound, bound)

        query = jax.random.normal(k_q, (batch, dim), jnp.float32)
        ref = jax.random.normal(k_r, (sourceL, batch, dim), jnp.float32)

        e, logits = attention_forward(query, ref, wq, bq, wr, br, v,
                                      use_tanh=use_tanh, C=C,
                                      force_static=force_static)
        jax.block_until_ready((e, logits))

        e_ref, logits_ref = _reference_forward(query, ref, wq, bq, wr, br, v,
                                               use_tanh=use_tanh, C=C)
        assert e.shape == (batch, dim, sourceL)
        assert logits.shape == (batch, sourceL)
        err_e = float(jnp.max(jnp.abs(e - e_ref)))
        err_l = float(jnp.max(jnp.abs(logits - logits_ref)))
        assert jnp.allclose(e, e_ref, atol=1e-4, rtol=1e-4), f"e mismatch {err_e}"
        assert jnp.allclose(logits, logits_ref, atol=1e-4, rtol=1e-4), \
            f"logits mismatch {err_l}"

    # Whole-batch tile (TB=2) + dynamic per-batch loop.
    run_case(0, batch=2, dim=128, sourceL=16, use_tanh=False, C=10.0)
    # Real (2 x 1) grid, TB=8 batch tiling, use_tanh branch, dynamic loop.
    run_case(1, batch=16, dim=128, sourceL=256, use_tanh=True, C=10.0)
    # Same math through the static-unroll fallback path.
    run_case(2, batch=8, dim=128, sourceL=128, use_tanh=False, C=10.0,
             force_static=True)

    print("KERNEL_OK")
</pallas_src>

<mosaic_0001>
module attributes {stable_mosaic.version = 11 : i64} {
  func.func @_attention_kernel(%arg0: i32, %arg1: i32, %arg2: memref<2x128x1xf32, #tpu.memory_space<vmem>>, %arg3: memref<16x256xf32, #tpu.memory_space<vmem>>, %arg4: memref<128x128xf32, #tpu.memory_space<vmem>>, %arg5: memref<128x1xf32, #tpu.memory_space<vmem>>, %arg6: memref<128x1xf32, #tpu.memory_space<vmem>>, %arg7: memref<2x128x16xf32, #tpu.memory_space<vmem>>, %arg8: memref<2x1x16xf32, #tpu.memory_space<vmem>>) attributes {dimension_semantics = [#tpu.dimension_semantics<parallel>, #tpu.dimension_semantics<parallel>], iteration_bounds = array<i64: 1, 1>, scalar_prefetch = 0 : i64, scratch_operands = 0 : i64, tpu.core_type = #tpu.core_type<tc>, window_params = [{transform_indices = @transform_0, window_bounds = array<i64: 2, 128, 1>}, {transform_indices = @transform_1, window_bounds = array<i64: 16, 256>}, {pipeline_mode = #tpu.pipeline_mode<synchronous>, transform_indices = @transform_2, window_bounds = array<i64: 128, 128>}, {pipeline_mode = #tpu.pipeline_mode<synchronous>, transform_indices = @transform_3, window_bounds = array<i64: 128, 1>}, {pipeline_mode = #tpu.pipeline_mode<synchronous>, transform_indices = @transform_4, window_bounds = array<i64: 128, 1>}, {transform_indices = @transform_5, window_bounds = array<i64: 2, 128, 16>}, {transform_indices = @transform_6, window_bounds = array<i64: 2, 1, 16>}]} {
    %c0 = arith.constant 0 : index
    %c0_0 = arith.constant 0 : index
    %0 = vector.load %arg4[%c0, %c0_0] : memref<128x128xf32, #tpu.memory_space<vmem>>, vector<128x128xf32>
    %c0_1 = arith.constant 0 : index
    %c0_2 = arith.constant 0 : index
    %1 = vector.load %arg5[%c0_1, %c0_2] : memref<128x1xf32, #tpu.memory_space<vmem>>, vector<128x1xf32>
    %c0_3 = arith.constant 0 : index
    %c0_4 = arith.constant 0 : index
    %2 = vector.load %arg6[%c0_3, %c0_4] : memref<128x1xf32, #tpu.memory_space<vmem>>, vector<128x1xf32>
    %c0_i32 = arith.constant 0 : i32
    %c2_i32 = arith.constant 2 : i32
    %3 = arith.addi %c0_i32, %c2_i32 : i32
    %c1_i32 = arith.constant 1 : i32
    scf.for %arg9 = %c0_i32 to %3 step %c1_i32  : i32 {
      %c1_i32_6 = arith.constant 1 : i32
      %4 = arith.muli %arg9, %c1_i32_6 : i32
      %c0_i32_7 = arith.constant 0 : i32
      %5 = arith.addi %c0_i32_7, %4 : i32
      %c128_i32 = arith.constant 128 : i32
      %6 = arith.muli %5, %c128_i32 : i32
      %7 = tpu.assume_multiple %6, 128 : i32
      %c0_8 = arith.constant 0 : index
      %8 = arith.index_cast %7 : i32 to index
      %9 = vector.load %arg3[%c0_8, %8] : memref<16x256xf32, #tpu.memory_space<vmem>>, vector<16x128xf32>
      %cst = arith.constant dense<0.000000e+00> : vector<128x16xf32>
      %10 = tpu.matmul %0, %9, %cst {dimension_numbers = #tpu.dot_dimension_numbers<[1], [1], [0], [0], [0, 0, 1, 0], [], []>} : vector<128x128xf32>, vector<16x128xf32>, vector<128x16xf32> -> vector<128x16xf32>
      %11 = vector.broadcast %1 : vector<128x1xf32> to vector<128x16xf32>
      %12 = arith.addf %10, %11 : vector<128x16xf32>
      %13 = arith.index_cast %5 : i32 to index
      %c0_9 = arith.constant 0 : index
      %c0_10 = arith.constant 0 : index
      %14 = vector.load %arg7[%13, %c0_9, %c0_10] : memref<2x128x16xf32, #tpu.memory_space<vmem>>, vector<1x128x16xf32>
      %15 = vector.shape_cast %14 : vector<1x128x16xf32> to vector<128x16xf32>
      %16 = vector.shape_cast %12 : vector<128x16xf32> to vector<1x128x16xf32>
      tpu.vector_store %arg7[%13, %c0_9, %c0_10], %16 {strides = array<i32>} : memref<2x128x16xf32, #tpu.memory_space<vmem>>, vector<1x128x16xf32>,
      %17 = arith.index_cast %5 : i32 to index
      %c0_11 = arith.constant 0 : index
      %c0_12 = arith.constant 0 : index
      %18 = vector.load %arg2[%17, %c0_11, %c0_12] : memref<2x128x1xf32, #tpu.memory_space<vmem>>, vector<1x128x1xf32>
      %19 = vector.shape_cast %18 : vector<1x128x1xf32> to vector<128x1xf32>
      %20 = vector.broadcast %19 : vector<128x1xf32> to vector<128x16xf32>
      %21 = arith.addf %12, %20 : vector<128x16xf32>
      %22 = math.tanh %21 : vector<128x16xf32>
      %23 = vector.broadcast %2 : vector<128x1xf32> to vector<128x16xf32>
      %24 = arith.mulf %23, %22 : vector<128x16xf32>
      %cst_13 = arith.constant dense<0.000000e+00> : vector<16xf32>
      %25 = vector.multi_reduction <add>, %24, %cst_13 [0] : vector<128x16xf32> to vector<16xf32>
      %26 = vector.shape_cast %25 : vector<16xf32> to vector<1x16xf32>
      %27 = arith.index_cast %5 : i32 to index
      %c0_14 = arith.constant 0 : index
      %c0_15 = arith.constant 0 : index
      %28 = vector.load %arg8[%27, %c0_14, %c0_15] : memref<2x1x16xf32, #tpu.memory_space<vmem>>, vector<1x1x16xf32>
      %29 = vector.shape_cast %28 : vector<1x1x16xf32> to vector<1x16xf32>
      %30 = vector.shape_cast %26 : vector<1x16xf32> to vector<1x1x16xf32>
      tpu.vector_store %arg8[%27, %c0_14, %c0_15], %30 {strides = array<i32>} : memref<2x1x16xf32, #tpu.memory_space<vmem>>, vector<1x1x16xf32>,
    }
    %c2_i32_5 = arith.constant 2 : i32
    return
  }
  func.func @transform_0(%arg0: i32, %arg1: i32) -> (i32, i32, i32) {
    %c0_i32 = arith.constant 0 : i32
    %c0_i32_0 = arith.constant 0 : i32
    %c0_i32_1 = arith.constant 0 : i32
    return %arg0, %c0_i32, %c0_i32_0 : i32, i32, i32
  }
  func.func @transform_1(%arg0: i32, %arg1: i32) -> (i32, i32) {
    %c0_i32 = arith.constant 0 : i32
    return %arg1, %arg0 : i32, i32
  }
  func.func @transform_2(%arg0: i32, %arg1: i32) -> (i32, i32) {
    %c0_i32 = arith.constant 0 : i32
    %c0_i32_0 = arith.constant 0 : i32
    %c0_i32_1 = arith.constant 0 : i32
    return %c0_i32, %c0_i32_0 : i32, i32
  }
  func.func @transform_3(%arg0: i32, %arg1: i32) -> (i32, i32) {
    %c0_i32 = arith.constant 0 : i32
    %c0_i32_0 = arith.constant 0 : i32
    %c0_i32_1 = arith.constant 0 : i32
    return %c0_i32, %c0_i32_0 : i32, i32
  }
  func.func @transform_4(%arg0: i32, %arg1: i32) -> (i32, i32) {
    %c0_i32 = arith.constant 0 : i32
    %c0_i32_0 = arith.constant 0 : i32
    %c0_i32_1 = arith.constant 0 : i32
    return %c0_i32, %c0_i32_0 : i32, i32
  }
  func.func @transform_5(%arg0: i32, %arg1: i32) -> (i32, i32, i32) {
    %c0_i32 = arith.constant 0 : i32
    %c0_i32_0 = arith.constant 0 : i32
    return %arg0, %c0_i32, %arg1 : i32, i32, i32
  }
  func.func @transform_6(%arg0: i32, %arg1: i32) -> (i32, i32, i32) {
    %c0_i32 = arith.constant 0 : i32
    %c0_i32_0 = arith.constant 0 : i32
    return %arg0, %c0_i32, %arg1 : i32, i32, i32
  }
}

module attributes {stable_mosaic.version = 11 : i64} {
  func.func @_attention_kernel(%arg0: i32, %arg1: i32, %arg2: memref<2x128x1xf32, #tpu.memory_space<vmem>>, %arg3: memref<16x256xf32, #tpu.memory_space<vmem>>, %arg4: memref<128x128xf32, #tpu.memory_space<vmem>>, %arg5: memref<128x1xf32, #tpu.memory_space<vmem>>, %arg6: memref<128x1xf32, #tpu.memory_space<vmem>>, %arg7: memref<2x128x16xf32, #tpu.memory_space<vmem>>, %arg8: memref<2x1x16xf32, #tpu.memory_space<vmem>>) attributes {dimension_semantics = [#tpu.dimension_semantics<parallel>, #tpu.dimension_semantics<parallel>], iteration_bounds = array<i64: 1, 1>, scalar_prefetch = 0 : i64, scratch_operands = 0 : i64, tpu.core_type = #tpu.core_type<tc>, window_params = [{transform_indices = @transform_0, window_bounds = array<i64: 2, 128, 1>}, {transform_indices = @transform_1, window_bounds = array<i64: 16, 256>}, {pipeline_mode = #tpu.pipeline_mode<synchronous>, transform_indices = @transform_2, window_bounds = array<i64: 128, 128>}, {pipeline_mode = #tpu.pipeline_mode<synchronous>, transform_indices = @transform_3, window_bounds = array<i64: 128, 1>}, {pipeline_mode = #tpu.pipeline_mode<synchronous>, transform_indices = @transform_4, window_bounds = array<i64: 128, 1>}, {transform_indices = @transform_5, window_bounds = array<i64: 2, 128, 16>}, {transform_indices = @transform_6, window_bounds = array<i64: 2, 1, 16>}]} {
    %c0 = arith.constant 0 : index
    %c0_0 = arith.constant 0 : index
    %0 = vector.load %arg4[%c0, %c0_0] : memref<128x128xf32, #tpu.memory_space<vmem>>, vector<128x128xf32>
    %c0_1 = arith.constant 0 : index
    %c0_2 = arith.constant 0 : index
    %1 = vector.load %arg5[%c0_1, %c0_2] : memref<128x1xf32, #tpu.memory_space<vmem>>, vector<128x1xf32>
    %c0_3 = arith.constant 0 : index
    %c0_4 = arith.constant 0 : index
    %2 = vector.load %arg6[%c0_3, %c0_4] : memref<128x1xf32, #tpu.memory_space<vmem>>, vector<128x1xf32>
    %c0_5 = arith.constant 0 : index
    %c0_6 = arith.constant 0 : index
    %3 = vector.load %arg3[%c0_5, %c0_6] : memref<16x256xf32, #tpu.memory_space<vmem>>, vector<16x128xf32>
    %cst = arith.constant dense<0.000000e+00> : vector<128x16xf32>
    %4 = tpu.matmul %0, %3, %cst {dimension_numbers = #tpu.dot_dimension_numbers<[1], [1], [0], [0], [0, 0, 1, 0], [], []>} : vector<128x128xf32>, vector<16x128xf32>, vector<128x16xf32> -> vector<128x16xf32>
    %5 = vector.broadcast %1 : vector<128x1xf32> to vector<128x16xf32>
    %6 = arith.addf %4, %5 : vector<128x16xf32>
    %c0_7 = arith.constant 0 : index
    %c0_8 = arith.constant 0 : index
    %c0_9 = arith.constant 0 : index
    %7 = vector.load %arg7[%c0_7, %c0_8, %c0_9] : memref<2x128x16xf32, #tpu.memory_space<vmem>>, vector<1x128x16xf32>
    %8 = vector.shape_cast %7 : vector<1x128x16xf32> to vector<128x16xf32>
    %9 = vector.shape_cast %6 : vector<128x16xf32> to vector<1x128x16xf32>
    tpu.vector_store %arg7[%c0_7, %c0_8, %c0_9], %9 {strides = array<i32>} : memref<2x128x16xf32, #tpu.memory_space<vmem>>, vector<1x128x16xf32>,
    %c0_10 = arith.constant 0 : index
    %c0_11 = arith.constant 0 : index
    %c0_12 = arith.constant 0 : index
    %10 = vector.load %arg2[%c0_10, %c0_11, %c0_12] : memref<2x128x1xf32, #tpu.memory_space<vmem>>, vector<1x128x1xf32>
    %11 = vector.shape_cast %10 : vector<1x128x1xf32> to vector<128x1xf32>
    %12 = vector.broadcast %11 : vector<128x1xf32> to vector<128x16xf32>
    %13 = arith.addf %6, %12 : vector<128x16xf32>
    %14 = math.tanh %13 : vector<128x16xf32>
    %15 = vector.broadcast %2 : vector<128x1xf32> to vector<128x16xf32>
    %16 = arith.mulf %15, %14 : vector<128x16xf32>
    %cst_13 = arith.constant dense<0.000000e+00> : vector<16xf32>
    %17 = vector.multi_reduction <add>, %16, %cst_13 [0] : vector<128x16xf32> to vector<16xf32>
    %18 = vector.shape_cast %17 : vector<16xf32> to vector<1x16xf32>
    %c0_14 = arith.constant 0 : index
    %c0_15 = arith.constant 0 : index
    %c0_16 = arith.constant 0 : index
    %19 = vector.load %arg8[%c0_14, %c0_15, %c0_16] : memref<2x1x16xf32, #tpu.memory_space<vmem>>, vector<1x1x16xf32>
    %20 = vector.shape_cast %19 : vector<1x1x16xf32> to vector<1x16xf32>
    %21 = vector.shape_cast %18 : vector<1x16xf32> to vector<1x1x16xf32>
    tpu.vector_store %arg8[%c0_14, %c0_15, %c0_16], %21 {strides = array<i32>} : memref<2x1x16xf32, #tpu.memory_space<vmem>>, vector<1x1x16xf32>,
    %c0_17 = arith.constant 0 : index
    %c128 = arith.constant 128 : index
    %22 = vector.load %arg3[%c0_17, %c128] : memref<16x256xf32, #tpu.memory_space<vmem>>, vector<16x128xf32>
    %cst_18 = arith.constant dense<0.000000e+00> : vector<128x16xf32>
    %23 = tpu.matmul %0, %22, %cst_18 {dimension_numbers = #tpu.dot_dimension_numbers<[1], [1], [0], [0], [0, 0, 1, 0], [], []>} : vector<128x128xf32>, vector<16x128xf32>, vector<128x16xf32> -> vector<128x16xf32>
    %24 = vector.broadcast %1 : vector<128x1xf32> to vector<128x16xf32>
    %25 = arith.addf %23, %24 : vector<128x16xf32>
    %c1 = arith.constant 1 : index
    %c0_19 = arith.constant 0 : index
    %c0_20 = arith.constant 0 : index
    %26 = vector.load %arg7[%c1, %c0_19, %c0_20] : memref<2x128x16xf32, #tpu.memory_space<vmem>>, vector<1x128x16xf32>
    %27 = vector.shape_cast %26 : vector<1x128x16xf32> to vector<128x16xf32>
    %28 = vector.shape_cast %25 : vector<128x16xf32> to vector<1x128x16xf32>
    tpu.vector_store %arg7[%c1, %c0_19, %c0_20], %28 {strides = array<i32>} : memref<2x128x16xf32, #tpu.memory_space<vmem>>, vector<1x128x16xf32>,
    %c1_21 = arith.constant 1 : index
    %c0_22 = arith.constant 0 : index
    %c0_23 = arith.constant 0 : index
    %29 = vector.load %arg2[%c1_21, %c0_22, %c0_23] : memref<2x128x1xf32, #tpu.memory_space<vmem>>, vector<1x128x1xf32>
    %30 = vector.shape_cast %29 : vector<1x128x1xf32> to vector<128x1xf32>
    %31 = vector.broadcast %30 : vector<128x1xf32> to vector<128x16xf32>
    %32 = arith.addf %25, %31 : vector<128x16xf32>
    %33 = math.tanh %32 : vector<128x16xf32>
    %34 = vector.broadcast %2 : vector<128x1xf32> to vector<128x16xf32>
    %35 = arith.mulf %34, %33 : vector<128x16xf32>
    %cst_24 = arith.constant dense<0.000000e+00> : vector<16xf32>
    %36 = vector.multi_reduction <add>, %35, %cst_24 [0] : vector<128x16xf32> to vector<16xf32>
    %37 = vector.shape_cast %36 : vector<16xf32> to vector<1x16xf32>
    %c1_25 = arith.constant 1 : index
    %c0_26 = arith.constant 0 : index
    %c0_27 = arith.constant 0 : index
    %38 = vector.load %arg8[%c1_25, %c0_26, %c0_27] : memref<2x1x16xf32, #tpu.memory_space<vmem>>, vector<1x1x16xf32>
    %39 = vector.shape_cast %38 : vector<1x1x16xf32> to vector<1x16xf32>
    %40 = vector.shape_cast %37 : vector<1x16xf32> to vector<1x1x16xf32>
    tpu.vector_store %arg8[%c1_25, %c0_26, %c0_27], %40 {strides = array<i32>} : memref<2x1x16xf32, #tpu.memory_space<vmem>>, vector<1x1x16xf32>,
    return
  }
  func.func @transform_0(%arg0: i32, %arg1: i32) -> (i32, i32, i32) {
    %c0_i32 = arith.constant 0 : i32
    %c0_i32_0 = arith.constant 0 : i32
    %c0_i32_1 = arith.constant 0 : i32
    return %arg0, %c0_i32, %c0_i32_0 : i32, i32, i32
  }
  func.func @transform_1(%arg0: i32, %arg1: i32) -> (i32, i32) {
    %c0_i32 = arith.constant 0 : i32
    return %arg1, %arg0 : i32, i32
  }
  func.func @transform_2(%arg0: i32, %arg1: i32) -> (i32, i32) {
    %c0_i32 = arith.constant 0 : i32
    %c0_i32_0 = arith.constant 0 : i32
    %c0_i32_1 = arith.constant 0 : i32
    return %c0_i32, %c0_i32_0 : i32, i32
  }
  func.func @transform_3(%arg0: i32, %arg1: i32) -> (i32, i32) {
    %c0_i32 = arith.constant 0 : i32
    %c0_i32_0 = arith.constant 0 : i32
    %c0_i32_1 = arith.constant 0 : i32
    return %c0_i32, %c0_i32_0 : i32, i32
  }
  func.func @transform_4(%arg0: i32, %arg1: i32) -> (i32, i32) {
    %c0_i32 = arith.constant 0 : i32
    %c0_i32_0 = arith.constant 0 : i32
    %c0_i32_1 = arith.constant 0 : i32
    return %c0_i32, %c0_i32_0 : i32, i32
  }
  func.func @transform_5(%arg0: i32, %arg1: i32) -> (i32, i32, i32) {
    %c0_i32 = arith.constant 0 : i32
    %c0_i32_0 = arith.constant 0 : i32
    return %arg0, %c0_i32, %arg1 : i32, i32, i32
  }
  func.func @transform_6(%arg0: i32, %arg1: i32) -> (i32, i32, i32) {
    %c0_i32 = arith.constant 0 : i32
    %c0_i32_0 = arith.constant 0 : i32
    return %arg0, %c0_i32, %arg1 : i32, i32, i32
  }
}

</mosaic_0001>

<bundles_post_ra>
// kernel: tpu_custom_call.1
= control target key start
LH: loop header
LB: loop body
LE: loop exit
PB: predicated region body
PF: predicated region fallthrough
CT: control target
= control target key end

     0   :  { %12 = vsyncpa [#allocation3], 0  ;;  %s1035_s17 = smov 0   ;;  %s1261_s0 = inlined_call_operand.vmem [shape: f32[2,128,1], index: 0, kind: input, shape index: {}]   ;;  %s1262_s1 = inlined_call_operand.vmem [shape: f32[16,256], index: 1, kind: input, shape index: {}]   ;;  %s1263_s2 = inlined_call_operand.vmem [shape: f32[128,128], index: 2, kind: input, shape index: {}]   ;;  %s1264_s3 = inlined_call_operand.vmem [shape: f32[128,1], index: 3, kind: input, shape index: {}]   ;;  %s1265_s4 = inlined_call_operand.vmem [shape: f32[128,1], index: 4, kind: input, shape index: {}]   ;;  %s1266_s5 = inlined_call_operand.vmem [shape: f32[2,128,16], index: 5, kind: output, shape index: {0}]   ;;  %s1267_s6 = inlined_call_operand.hbm [shape: f32[2,1,16], index: 6, kind: output, shape index: {1}]  }
   0x1   :  { %v798_v0 = vld [vmem:[%s1263_s2] sm:$0xff]  ;;  %v803_v1 = vld [vmem:[%s1263_s2 + $0x8] sm:$0xff]  ;;  %v808_v2 = vld [vmem:[%s1263_s2 + $0x10] sm:$0xff] }
   0x2   :  { %1268 = vst [vmem:[#allocation5_spill] sm:$0xff] %v798_v0  ;;  %1269 = vst [vmem:[#allocation6_spill] sm:$0xff] %v803_v1  ;;  %v813_v3 = vld [vmem:[%s1263_s2 + $0x18] sm:$0xff]  ;;  %v818_v4 = vld [vmem:[%s1263_s2 + $0x20] sm:$0xff] }
   0x3   :  { %1270 = vst [vmem:[#allocation7_spill] sm:$0xff] %v808_v2  ;;  %1271 = vst [vmem:[#allocation8_spill] sm:$0xff] %v813_v3  ;;  %v823_v5 = vld [vmem:[%s1263_s2 + $0x28] sm:$0xff]  ;;  %v828_v6 = vld [vmem:[%s1263_s2 + $0x30] sm:$0xff] }
   0x4   :  { %1272 = vst [vmem:[#allocation9_spill] sm:$0xff] %v818_v4  ;;  %1273 = vst [vmem:[#allocation10_spill] sm:$0xff] %v823_v5  ;;  %v833_v7 = vld [vmem:[%s1263_s2 + $0x38] sm:$0xff]  ;;  %v838_v8 = vld [vmem:[%s1263_s2 + $0x40] sm:$0xff] }
   0x5   :  { %1274 = vst [vmem:[#allocation11_spill] sm:$0xff] %v828_v6  ;;  %1275 = vst [vmem:[#allocation12_spill] sm:$0xff] %v833_v7  ;;  %v843_v9 = vld [vmem:[%s1263_s2 + $0x48] sm:$0xff]  ;;  %v848_v10 = vld [vmem:[%s1263_s2 + $0x50] sm:$0xff] }
   0x6   :  { %1276 = vst [vmem:[#allocation13_spill] sm:$0xff] %v838_v8  ;;  %1277 = vst [vmem:[#allocation14_spill] sm:$0xff] %v843_v9  ;;  %v853_v11 = vld [vmem:[%s1263_s2 + $0x58] sm:$0xff]  ;;  %v858_v12 = vld [vmem:[%s1263_s2 + $0x60] sm:$0xff] }
   0x7   :  { %1278 = vst [vmem:[#allocation15_spill] sm:$0xff] %v848_v10  ;;  %1279 = vst [vmem:[#allocation16_spill] sm:$0xff] %v853_v11  ;;  %v863_v13 = vld [vmem:[%s1263_s2 + $0x68] sm:$0xff]  ;;  %v868_v14 = vld [vmem:[%s1263_s2 + $0x70] sm:$0xff] }
   0x8   :  { %1280 = vst [vmem:[#allocation17_spill] sm:$0xff] %v858_v12  ;;  %1281 = vst [vmem:[#allocation18_spill] sm:$0xff] %v863_v13  ;;  %v873_v15 = vld [vmem:[%s1263_s2 + $0x78] sm:$0xff]  ;;  %v878_v16 = vld [vmem:[%s1264_s3] sm:$0xff] }
   0x9   :  { %1282 = vst [vmem:[#allocation19_spill] sm:$0xff] %v868_v14  ;;  %1283 = vst [vmem:[#allocation20_spill] sm:$0xff] %v873_v15  ;;  %v883_v17 = vld [vmem:[%s1264_s3 + $0x8] sm:$0xff]  ;;  %v888_v18 = vld [vmem:[%s1264_s3 + $0x10] sm:$0xff] }
   0xa   :  { %1284 = vst [vmem:[#allocation21_spill] sm:$0xff] %v878_v16  ;;  %1285 = vst [vmem:[#allocation22_spill] sm:$0xff] %v883_v17  ;;  %v893_v19 = vld [vmem:[%s1264_s3 + $0x18] sm:$0xff]  ;;  %v898_v20 = vld [vmem:[%s1264_s3 + $0x20] sm:$0xff] }
   0xb   :  { %1286 = vst [vmem:[#allocation23_spill] sm:$0xff] %v888_v18  ;;  %1287 = vst [vmem:[#allocation24_spill] sm:$0xff] %v893_v19  ;;  %v903_v21 = vld [vmem:[%s1264_s3 + $0x28] sm:$0xff]  ;;  %v908_v22 = vld [vmem:[%s1264_s3 + $0x30] sm:$0xff] }
   0xc   :  { %1288 = vst [vmem:[#allocation25_spill] sm:$0xff] %v898_v20  ;;  %1289 = vst [vmem:[#allocation26_spill] sm:$0xff] %v903_v21  ;;  %v913_v23 = vld [vmem:[%s1264_s3 + $0x38] sm:$0xff]  ;;  %v918_v24 = vld [vmem:[%s1264_s3 + $0x40] sm:$0xff] }
   0xd   :  { %1290 = vst [vmem:[#allocation27_spill] sm:$0xff] %v908_v22  ;;  %1291 = vst [vmem:[#allocation28_spill] sm:$0xff] %v913_v23  ;;  %v923_v25 = vld [vmem:[%s1264_s3 + $0x48] sm:$0xff]  ;;  %v928_v26 = vld [vmem:[%s1264_s3 + $0x50] sm:$0xff] }
   0xe   :  { %1292 = vst [vmem:[#allocation29_spill] sm:$0xff] %v918_v24  ;;  %1293 = vst [vmem:[#allocation30_spill] sm:$0xff] %v923_v25  ;;  %v933_v27 = vld [vmem:[%s1264_s3 + $0x58] sm:$0xff]  ;;  %v938_v28 = vld [vmem:[%s1264_s3 + $0x60] sm:$0xff] }
   0xf   :  { %1294 = vst [vmem:[#allocation31_spill] sm:$0xff] %v928_v26  ;;  %1295 = vst [vmem:[#allocation32_spill] sm:$0xff] %v933_v27  ;;  %v943_v29 = vld [vmem:[%s1264_s3 + $0x68] sm:$0xff]  ;;  %v948_v30 = vld [vmem:[%s1264_s3 + $0x70] sm:$0xff] }
  0x10   :  { %1296 = vst [vmem:[#allocation33_spill] sm:$0xff] %v938_v28  ;;  %v953_v31 = vld [vmem:[%s1264_s3 + $0x78] sm:$0xff]  ;;  %v958_v32 = vld [vmem:[%s1265_s4] sm:$0xff]  ;;  %v963_v33 = vld [vmem:[%s1265_s4 + $0x8] sm:$0xff] }
  0x11   :  { %v968_v34 = vld [vmem:[%s1265_s4 + $0x10] sm:$0xff]  ;;  %v973_v35 = vld [vmem:[%s1265_s4 + $0x18] sm:$0xff]  ;;  %v978_v36 = vld [vmem:[%s1265_s4 + $0x20] sm:$0xff] }
  0x12   :  { %v983_v37 = vld [vmem:[%s1265_s4 + $0x28] sm:$0xff]  ;;  %v988_v38 = vld [vmem:[%s1265_s4 + $0x30] sm:$0xff]  ;;  %v993_v39 = vld [vmem:[%s1265_s4 + $0x38] sm:$0xff] }
  0x13   :  { %v998_v40 = vld [vmem:[%s1265_s4 + $0x40] sm:$0xff]  ;;  %v1003_v41 = vld [vmem:[%s1265_s4 + $0x48] sm:$0xff]  ;;  %v1008_v42 = vld [vmem:[%s1265_s4 + $0x50] sm:$0xff] }
  0x14   :  { %v1013_v43 = vld [vmem:[%s1265_s4 + $0x58] sm:$0xff]  ;;  %v1018_v44 = vld [vmem:[%s1265_s4 + $0x60] sm:$0xff]  ;;  %v1023_v45 = vld [vmem:[%s1265_s4 + $0x68] sm:$0xff] }
  0x15   :  { %v1028_v46 = vld [vmem:[%s1265_s4 + $0x70] sm:$0xff]  ;;  %v1033_v47 = vld [vmem:[%s1265_s4 + $0x78] sm:$0xff] }
  0x16 LB: > { %v1297_v0 = vld [vmem:[#allocation5_spill] sm:$0xff]  ;;  %v756_v48 = vmov 0   ;;  %v1299_v18 = vld [vmem:[#allocation23_spill] sm:$0xff]  ;;  %s1045_s4 = sshll.u32 %s754_s17, 7  ;;  %v1301_v19 = vld [vmem:[#allocation24_spill] sm:$0xff]  ;;  %vm310_vm0 = vcmask 130048   ;;  %s754_s17 = sphi %s1035_s17, %s76_s17  }
  0x17   : > { %648 = vmatprep.mubr.f32.mxu0 %v1297_v0  ;;  %v1298_v8 = vld [vmem:[#allocation13_spill] sm:$0xff]  ;;  %691 = vset.pattern.permute.xlu1 %v756_v48  ;;  %s78_s18 = sshra.s32 %s1045_s4, 7  ;;  %v1302_v17 = vld [vmem:[#allocation22_spill] sm:$0xff]  ;;  %v1305_v23 = vld [vmem:[#allocation28_spill] sm:$0xff]  ;;  %s1079_s24 = scalar_lea.vmem %s1261_s0, %s1045_s4  ;;  %vm590_vm1 = vcmask 122880  }
  0x18   : > { %660 = vmatprep.mubr.f32.mxu1 %v1298_v8  ;;  %690 = vset.pattern.permute.xlu0 %v756_v48  ;;  %v1300_v16 = vld [vmem:[#allocation21_spill] sm:$0xff]  ;;  %s625_s3 = sshll.u32 %s78_s18, 3  ;;  %v1303_v21 = vld [vmem:[#allocation26_spill] sm:$0xff]  ;;  %v1306_v22 = vld [vmem:[#allocation27_spill] sm:$0xff]  ;;  %s1161_s27 = scalar_lea.vmem %s1266_s5, %s1045_s4 }
  0x19   : > { %96 = vperm.xlu1 %691, %v1299_v18   ;;  %86 = vperm.xlu0 %690, %v1300_v16   ;;  %s81_s21 = scalar_lea.vmem %s1262_s1, %s625_s3  ;;  %v1304_v20 = vld [vmem:[#allocation25_spill] sm:$0xff]  ;;  %v1307_v1 = vld [vmem:[#allocation6_spill] sm:$0xff]  ;;  %v1311_v2 = vld [vmem:[#allocation7_spill] sm:$0xff]  ;;  %s589_s28 = scalar_lea.vmem [#allocation2], %s754_s17 }
  0x1a   : > { %v82_v49 = vld [vmem:[%s81_s21] sm:$0xff]  ;;  %v83_v50 = vld [vmem:[%s81_s21 + $0x10] sm:$0xff]  ;;  %v329_v52 = vld [vmem:[%s1079_s24 + $0x8] sm:$0xff]  ;;  %s76_s17 = sadd.s32 1, %s754_s17  }
  0x1b   : > { %v672_v51 = vpack.c.bf16 %v83_v50, %v82_v49  ;;  %v1308_v9 = vld [vmem:[#allocation14_spill] sm:$0xff]  ;;  %v1310_v24 = vld [vmem:[#allocation29_spill] sm:$0xff]  ;;  %v1312_v10 = vld [vmem:[#allocation15_spill] sm:$0xff]  ;;  %p73_p0 = scmp.ge.s32.totalorder %s76_s17, 2  }
  0x1c   : > { %v1309_v25 = vld [vmem:[#allocation30_spill] sm:$0xff]  ;;  %v1313_v3 = vld [vmem:[#allocation8_spill] sm:$0xff]  ;;  %v1316_v26 = vld [vmem:[#allocation31_spill] sm:$0xff]  ;;  %s757_s29 = smov (%p73_p0), [#allocation2]  }
  0x1d   : > { %101 = vperm.xlu1 %691, %v1301_v19   ;;  %91 = vperm.xlu0 %690, %v1302_v17   ;;  %v1314_v11 = vld [vmem:[#allocation16_spill] sm:$0xff]  ;;  %v1317_v4 = vld [vmem:[#allocation9_spill] sm:$0xff]  ;;  %v1319_v5 = vld [vmem:[#allocation10_spill] sm:$0xff]  ;;  %s599_s30 = sshll.u32 (%p73_p0), %s757_s29, 4  ;;  %s600_s30 = int_to_ptr.vmem [resolvable:$true] %s599_s30 }
  0x1e   : > { %673 = vmatprep.subr.bf16.mxu0 %v672_v51  ;;  %676 = vmatprep.subr.bf16.mxu1 %v672_v51  ;;  %v1315_v27 = vld [vmem:[#allocation32_spill] sm:$0xff]  ;;  %v1318_v12 = vld [vmem:[#allocation17_spill] sm:$0xff]  ;;  %v1320_v13 = vld [vmem:[#allocation18_spill] sm:$0xff]  ;;  %s724_s7 = scalar_lea.vmem (%p73_p0), %s600_s30, 32  ;;  %p729_p2 = scmp.lt.s32.totalorder (%p73_p0), %s600_s30, %s600_s30 }
  0x1f   : > { %675 = vmatpush3.bf16.xpose.msra.mxu0 %v672_v51  ;;  %677 = vmatpush3.bf16.xpose.msra.mxu1 %v672_v51  ;;  %v1321_v28 = vld [vmem:[#allocation33_spill] sm:$0xff]  ;;  %v1322_v6 = vld [vmem:[#allocation11_spill] sm:$0xff]  ;;  %v1324_v7 = vld [vmem:[#allocation12_spill] sm:$0xff]  ;;  %p725_p1 = scmp.ne.s32.totalorder (%p73_p0), %s600_s30, %s724_s7  ;;  %p730_p3 = scmp.lt.s32.totalorder (%p73_p0), %s724_s7, %s724_s7 }
  0x20   : > { %v1323_v14 = vld [vmem:[#allocation19_spill] sm:$0xff]  ;;  %v1325_v15 = vld [vmem:[#allocation20_spill] sm:$0xff]  ;;  %v333_v56 = vld [vmem:[%s1079_s24 + $0x28] sm:$0xff] }
  0x21   : > { %111 = vperm.xlu1 %691, %v1303_v21   ;;  %106 = vperm.xlu0 %690, %v1304_v20   ;;  %v328_v53 = vld [vmem:[%s1079_s24] sm:$0xff]  ;;  %v331_v54 = vld [vmem:[%s1079_s24 + $0x18] sm:$0xff]  ;;  %v330_v55 = vld [vmem:[%s1079_s24 + $0x10] sm:$0xff]  ;;  %p731_p4 = por (%p73_p0), %p730_p3, %p729_p2 }
  0x22   : > { %v332_v57 = vld [vmem:[%s1079_s24 + $0x20] sm:$0xff]  ;;  %v335_v58 = vld [vmem:[%s1079_s24 + $0x38] sm:$0xff]  ;;  %v334_v59 = vld [vmem:[%s1079_s24 + $0x30] sm:$0xff] }
  0x23   : > { %v336_v60 = vld [vmem:[%s1079_s24 + $0x40] sm:$0xff]  ;;  %v337_v61 = vld [vmem:[%s1079_s24 + $0x48] sm:$0xff]  ;;  %v338_v62 = vld [vmem:[%s1079_s24 + $0x50] sm:$0xff]  ;;  %p732_p5 = pnand (%p73_p0), %p731_p4, %p725_p1 }
  0x24   : > { %v339_v63 = vld [vmem:[%s1079_s24 + $0x58] sm:$0xff]  ;;  %v340_v48 = vld [vmem:[%s1079_s24 + $0x60] sm:$0xff]  ;;  %v341_v49 = vld [vmem:[%s1079_s24 + $0x68] sm:$0xff] }
  0x25   : > { %121 = vperm.xlu1 %691, %v1305_v23   ;;  %116 = vperm.xlu0 %690, %v1306_v22   ;;  %v342_v50 = vld [vmem:[%s1079_s24 + $0x70] sm:$0xff]  ;;  %v343_v51 = vld [vmem:[%s1079_s24 + $0x78] sm:$0xff] }
  0x26   : > { %649 = vmatmul.mubr.f32.vlgmr.msra.gmra.mrb[0].mxu0 %v1307_v1  ;;  %661 = vmatmul.mubr.f32.vlgmr.msra.gmra.mrb[0].mxu1 %v1308_v9 }
  0x27   : > { %651 = vmatprep.mubr.f32.mxu0 %v1311_v2  ;;  %663 = vmatprep.mubr.f32.mxu1 %v1312_v10 }
  0x29   : > { %131 = vperm.xlu1 %691, %v1309_v25   ;;  %126 = vperm.xlu0 %690, %v1310_v24  }
  0x2a   : > { %652 = vmatmul.mubr.f32.gmra.mrb[2].mxu0 %v1313_v3  ;;  %664 = vmatmul.mubr.f32.gmra.mrb[2].mxu1 %v1314_v11 }
  0x2b   : > { %654 = vmatprep.mubr.f32.mxu0 %v1317_v4  ;;  %666 = vmatprep.mubr.f32.mxu1 %v1318_v12 }
  0x2d   : > { %141 = vperm.xlu1 %691, %v1315_v27   ;;  %136 = vperm.xlu0 %690, %v1316_v26  }
  0x2e   : > { %655 = vmatmul.mubr.f32.gmra.mrb[4].mxu0 %v1319_v5  ;;  %667 = vmatmul.mubr.f32.gmra.mrb[4].mxu1 %v1320_v13 }
  0x2f   : > { %657 = vmatprep.mubr.f32.mxu0 %v1322_v6  ;;  %669 = vmatprep.mubr.f32.mxu1 %v1323_v14 }
  0x31   : > { %151 = vperm.xlu1 %691, %v943_v29   ;;  %146 = vperm.xlu0 %690, %v1321_v28  }
  0x32   : > { %658 = vmatmul.mubr.f32.gmra.mrb[6].mxu0 %v1324_v7  ;;  %670 = vmatmul.mubr.f32.gmra.mrb[6].mxu1 %v1325_v15 }
  0x35   : > { %161 = vperm.xlu1 %691, %v953_v31   ;;  %156 = vperm.xlu0 %690, %v948_v30  }
  0x39   : > { %351 = vperm.xlu1 %691, %v329_v52   ;;  %346 = vperm.xlu0 %690, %v328_v53  }
  0x3d   : > { %361 = vperm.xlu1 %691, %v331_v54   ;;  %356 = vperm.xlu0 %690, %v330_v55  }
  0x41   : > { %371 = vperm.xlu1 %691, %v333_v56   ;;  %366 = vperm.xlu0 %690, %v332_v57  }
  0x45   : > { %381 = vperm.xlu1 %691, %v335_v58   ;;  %376 = vperm.xlu0 %690, %v334_v59  }
  0x49   : > { %463 = vperm.xlu1 %691, %v963_v33   ;;  %458 = vperm.xlu0 %690, %v958_v32  }
  0x4d   : > { %468 = vperm.xlu1 %691, %v968_v34   ;;  %386 = vperm.xlu0 %690, %v336_v60  }
  0x51   : > { %473 = vperm.xlu1 %691, %v973_v35   ;;  %391 = vperm.xlu0 %690, %v337_v61  }
  0x55   : > { %478 = vperm.xlu1 %691, %v978_v36   ;;  %396 = vperm.xlu0 %690, %v338_v62  }
  0x59   : > { %483 = vperm.xlu1 %691, %v983_v37   ;;  %401 = vperm.xlu0 %690, %v339_v63  }
  0x5d   : > { %488 = vperm.xlu1 %691, %v988_v38   ;;  %406 = vperm.xlu0 %690, %v340_v48  }
  0x61   : > { %493 = vperm.xlu1 %691, %v993_v39   ;;  %411 = vperm.xlu0 %690, %v341_v49  }
  0x65   : > { %498 = vperm.xlu1 %691, %v998_v40   ;;  %416 = vperm.xlu0 %690, %v342_v50  }
  0x69   : > { %503 = vperm.xlu1 %691, %v1003_v41   ;;  %421 = vperm.xlu0 %690, %v343_v51  }
  0x6d   : > { %513 = vperm.xlu1 %691, %v1013_v43   ;;  %508 = vperm.xlu0 %690, %v1008_v42  }
  0x71   : > { %523 = vperm.xlu1 %691, %v1023_v45   ;;  %518 = vperm.xlu0 %690, %v1018_v44  }
  0x75   : > { %533 = vperm.xlu1 %691, %v1033_v47   ;;  %528 = vperm.xlu0 %690, %v1028_v46  }
  0x98   : > { %v87_v52 = vpop.permute.xlu0 %86  ;;  %v97_v53 = vpop.permute.xlu1 %96 }
  0x9c   : > { %v92_v54 = vpop.permute.xlu0 %91  ;;  %v102_v55 = vpop.permute.xlu1 %101 }
  0xa0   : > { %v1117_v56 = vpop.permute.xlu0 %106  ;;  %v1119_v57 = vpop.permute.xlu1 %111 }
  0xa4   : > { %v1121_v58 = vpop.permute.xlu0 %116  ;;  %v1123_v59 = vpop.permute.xlu1 %121 }
  0xa8   : > { %v127_v60 = vpop.permute.xlu0 %126  ;;  %v132_v61 = vpop.permute.xlu1 %131 }
  0xac   : > { %v137_v62 = vpop.permute.xlu0 %136  ;;  %v142_v63 = vpop.permute.xlu1 %141 }
  0xb0   : > { %v1125_v48 = vpop.permute.xlu0 %146  ;;  %v152_v49 = vpop.permute.xlu1 %151 }
  0xb4   : > { %v1127_v50 = vpop.permute.xlu0 %156  ;;  %v1129_v51 = vpop.permute.xlu1 %161 }
  0xb8   : > { %v347_v0 = vpop.permute.xlu0 %346  ;;  %v352_v1 = vpop.permute.xlu1 %351 }
  0xbc   : > { %v357_v2 = vpop.permute.xlu0 %356  ;;  %v362_v3 = vpop.permute.xlu1 %361 }
  0xc0   : > { %v1131_v4 = vpop.permute.xlu0 %366  ;;  %v372_v5 = vpop.permute.xlu1 %371 }
  0xc4   : > { %v1133_v6 = vpop.permute.xlu0 %376  ;;  %v1135_v7 = vpop.permute.xlu1 %381 }
  0xc8   : > { %v1137_v8 = vpop.permute.xlu0 %458  ;;  %v1139_v9 = vpop.permute.xlu1 %463 }
  0xcc   : > { %v1141_v10 = vpop.permute.xlu0 %386  ;;  %v1143_v11 = vpop.permute.xlu1 %468 }
  0xd0   : > { %v1145_v12 = vpop.permute.xlu0 %391  ;;  %v1147_v13 = vpop.permute.xlu1 %473 }
  0xd4   : > { %v1149_v14 = vpop.permute.xlu0 %396  ;;  %v1151_v15 = vpop.permute.xlu1 %478 }
  0xd8   : > { %v1153_v16 = vpop.permute.xlu0 %401  ;;  %v1155_v17 = vpop.permute.xlu1 %483 }
  0xdc   : > { %v1165_v26 = vpop.permute.xlu0 %406 }
  0xf9   : > { %v650_v18 = vpop.f32.mrb[0].mxu0  ;;  %v662_v19 = vpop.f32.mrb[0].mxu1 }
  0xfa   : > { %v236_v20 = vadd.f32 %v650_v18, %v92_v54  ;;  %v1163_v21 = vadd.f32 %v662_v19, %v132_v61  ;;  %v230_v22 = vpop.f32.mrb[1].mxu0  ;;  %v270_v23 = vpop.f32.mrb[1].mxu1 }
  0xfb   : > { %v231_v24 = vadd.f32 %v230_v22, %v87_v52  ;;  %v271_v25 = vadd.f32 %v270_v23, %v127_v60  ;;  %v1178_v60 = vpop.permute.xlu1 %488 }
  0xfc   : > { %312 = vst.msk [vmem:[%s1161_s27 + $0x8] sm:$0xff] %vm310_vm0, %v236_v20  ;;  %v425_v27 = vadd.f32 %v352_v1, %v236_v20  ;;  %320 = vst.msk [vmem:[%s1161_s27 + $0x48] sm:$0xff] %vm310_vm0, %v1163_v21 }
  0xfd   : > { %311 = vst.msk [vmem:[%s1161_s27] sm:$0xff] %vm310_vm0, %v231_v24  ;;  %v424_v28 = vadd.f32 %v347_v0, %v231_v24  ;;  %319 = vst.msk [vmem:[%s1161_s27 + $0x40] sm:$0xff] %vm310_vm0, %v271_v25  ;;  %v653_v18 = vpop.f32.mrb[2].mxu0  ;;  %v665_v19 = vpop.f32.mrb[2].mxu1 }
  0xfe   : > { %692 = vtanh.f32 %v425_v27  ;;  %v246_v22 = vadd.f32 %v653_v18, %v102_v55  ;;  %v1176_v23 = vadd.f32 %v665_v19, %v142_v63  ;;  %v240_v52 = vpop.f32.mrb[3].mxu0  ;;  %v280_v1 = vpop.f32.mrb[3].mxu1 }
  0xff   : > { %v241_v20 = vadd.f32 %v240_v52, %v97_v53  ;;  %v281_v54 = vadd.f32 %v280_v1, %v137_v62  ;;  %694 = vtanh.f32 %v424_v28  ;;  %v412_v18 = vpop.permute.xlu0 %411  ;;  %v432_v52 = vadd.f32 %v1141_v10, %v271_v25 }
 0x100   : > { %314 = vst.msk [vmem:[%s1161_s27 + $0x18] sm:$0xff] %vm310_vm0, %v246_v22  ;;  %v427_v0 = vadd.f32 %v362_v3, %v246_v22  ;;  %322 = vst.msk [vmem:[%s1161_s27 + $0x58] sm:$0xff] %vm310_vm0, %v1176_v23  ;;  %v433_v25 = vadd.f32 %v1145_v12, %v1163_v21  ;;  %v435_v12 = vadd.f32 %v1153_v16, %v1176_v23 }
 0x101   : > { %313 = vst.msk [vmem:[%s1161_s27 + $0x10] sm:$0xff] %vm310_vm0, %v241_v20  ;;  %v426_v24 = vadd.f32 %v357_v2, %v241_v20  ;;  %321 = vst.msk [vmem:[%s1161_s27 + $0x50] sm:$0xff] %vm310_vm0, %v281_v54  ;;  %v656_v27 = vpop.f32.mrb[4].mxu0  ;;  %v668_v53 = vpop.f32.mrb[4].mxu1 }
 0x102   : > { %696 = vtanh.f32 %v427_v0  ;;  %v256_v28 = vadd.f32 %v656_v27, %v1119_v57  ;;  %v296_v55 = vadd.f32 %v668_v53, %v152_v49  ;;  %v250_v61 = vpop.f32.mrb[5].mxu0  ;;  %v290_v3 = vpop.f32.mrb[5].mxu1 }
 0x103   : > { %v251_v62 = vadd.f32 %v250_v61, %v1117_v56  ;;  %v291_v63 = vadd.f32 %v290_v3, %v1125_v48  ;;  %698 = vtanh.f32 %v426_v24  ;;  %v494_v0 = vpop.permute.xlu1 %493  ;;  %v417_v27 = vpop.permute.xlu0 %416 }
 0x104   : > { %316 = vst.msk [vmem:[%s1161_s27 + $0x28] sm:$0xff] %vm310_vm0, %v256_v28  ;;  %v429_v2 = vadd.f32 %v372_v5, %v256_v28  ;;  %324 = vst.msk [vmem:[%s1161_s27 + $0x68] sm:$0xff] %vm310_vm0, %v296_v55 }
 0x105   : > { %315 = vst.msk [vmem:[%s1161_s27 + $0x20] sm:$0xff] %vm310_vm0, %v251_v62  ;;  %v428_v19 = vadd.f32 %v1131_v4, %v251_v62  ;;  %323 = vst.msk [vmem:[%s1161_s27 + $0x60] sm:$0xff] %vm310_vm0, %v291_v63  ;;  %v659_v57 = vpop.f32.mrb[6].mxu0  ;;  %v671_v49 = vpop.f32.mrb[6].mxu1  ;;  %v436_v62 = vadd.f32 %v1165_v26, %v291_v63 }
 0x106   : > { %700 = vtanh.f32 %v429_v2  ;;  %v266_v56 = vadd.f32 %v659_v57, %v1123_v59  ;;  %v306_v48 = vadd.f32 %v671_v49, %v1129_v51  ;;  %v260_v5 = vpop.f32.mrb[7].mxu0  ;;  %v300_v22 = vpop.f32.mrb[7].mxu1  ;;  %v437_v57 = vadd.f32 %v412_v18, %v296_v55 }
 0x107   : > { %v261_v1 = vadd.f32 %v260_v5, %v1121_v58  ;;  %v301_v4 = vadd.f32 %v300_v22, %v1127_v50  ;;  %702 = vtanh.f32 %v428_v19  ;;  %v499_v28 = vpop.permute.xlu1 %498  ;;  %v422_v2 = vpop.permute.xlu0 %421 }
 0x108   : > { %v693_v20 = vpop.eup %692  ;;  %318 = vst.msk [vmem:[%s1161_s27 + $0x38] sm:$0xff] %vm310_vm0, %v266_v56  ;;  %v431_v24 = vadd.f32 %v1135_v7, %v266_v56  ;;  %326 = vst.msk [vmem:[%s1161_s27 + $0x78] sm:$0xff] %vm310_vm0, %v306_v48 }
 0x109   : > { %v537_v59 = vmul.f32 %v693_v20, %v1139_v9  ;;  %317 = vst.msk [vmem:[%s1161_s27 + $0x30] sm:$0xff] %vm310_vm0, %v261_v1  ;;  %v430_v51 = vadd.f32 %v1133_v6, %v261_v1  ;;  %325 = vst.msk [vmem:[%s1161_s27 + $0x70] sm:$0xff] %vm310_vm0, %v301_v4  ;;  %v695_v10 = vpop.eup %694  ;;  %v434_v9 = vadd.f32 %v1149_v14, %v281_v54 }
 0x10a   : > { %704 = vtanh.f32 %v431_v24  ;;  %v536_v50 = vmul.f32 %v695_v10, %v1137_v8  ;;  %v438_v5 = vadd.f32 %v417_v27, %v301_v4  ;;  %v439_v1 = vadd.f32 %v422_v2, %v306_v48 }
 0x10b   : > { %v553_v58 = vsel %vm310_vm0, %v537_v59, 0.0  ;;  %706 = vtanh.f32 %v432_v52  ;;  %v504_v23 = vpop.permute.xlu1 %503  ;;  %v509_v24 = vpop.permute.xlu0 %508 }
 0x10c   : > { %v697_v7 = vpop.eup %696  ;;  %708 = vtanh.f32 %v430_v51  ;;  %v552_v53 = vsel %vm310_vm0, %v536_v50, 0.0 }
 0x10d   : > { %v699_v6 = vpop.eup %698  ;;  %710 = vtanh.f32 %v433_v25  ;;  %v554_v61 = vadd.f32 %v553_v58, %v552_v53  ;;  %v539_v21 = vmul.f32 %v697_v7, %v1147_v13 }
 0x10e   : > { %v538_v3 = vmul.f32 %v699_v6, %v1143_v11  ;;  %712 = vtanh.f32 %v434_v9 }
 0x10f   : > { %714 = vtanh.f32 %v435_v12  ;;  %v557_v49 = vsel %vm310_vm0, %v539_v21, 0.0  ;;  %v514_v10 = vpop.permute.xlu1 %513  ;;  %v519_v9 = vpop.permute.xlu0 %518 }
 0x110   : > { %v701_v8 = vpop.eup %700  ;;  %v555_v14 = vsel %vm310_vm0, %v538_v3, 0.0  ;;  %716 = vtanh.f32 %v436_v62 }
 0x111   : > { %v703_v54 = vpop.eup %702  ;;  %v556_v19 = vadd.f32 %v555_v14, %v554_v61  ;;  %v541_v56 = vmul.f32 %v701_v8, %v1155_v17  ;;  %718 = vtanh.f32 %v437_v57 }
 0x112   : > { %v540_v16 = vmul.f32 %v703_v54, %v1151_v15  ;;  %720 = vtanh.f32 %v438_v5 }
 0x113   : > { %v558_v11 = vadd.f32 %v557_v49, %v556_v19  ;;  %v561_v55 = vsel %vm310_vm0, %v541_v56, 0.0  ;;  %722 = vtanh.f32 %v439_v1  ;;  %v524_v12 = vpop.permute.xlu1 %523  ;;  %v529_v57 = vpop.permute.xlu0 %528 }
 0x114   : > { %v705_v13 = vpop.eup %704  ;;  %v559_v26 = vsel %vm310_vm0, %v540_v16, 0.0 }
 0x115   : > { %v707_v22 = vpop.eup %706  ;;  %v560_v52 = vadd.f32 %v559_v26, %v558_v11  ;;  %v543_v18 = vmul.f32 %v705_v13, %v494_v0 }
 0x116   : > { %v709_v63 = vpop.eup %708  ;;  %v544_v59 = vmul.f32 %v707_v22, %v499_v28 }
 0x117   : > { %v542_v20 = vmul.f32 %v709_v63, %v1178_v60  ;;  %v711_v17 = vpop.eup %710  ;;  %v562_v15 = vadd.f32 %v561_v55, %v560_v52  ;;  %v565_v50 = vsel %vm310_vm0, %v543_v18, 0.0  ;;  %v534_v13 = vpop.permute.xlu1 %533 }
 0x118   : > { %v713_v4 = vpop.eup %712  ;;  %v545_v58 = vmul.f32 %v711_v17, %v504_v23  ;;  %v567_v0 = vsel %vm310_vm0, %v544_v59, 0.0 }
 0x119   : > { %v563_v51 = vsel %vm310_vm0, %v542_v20, 0.0  ;;  %v715_v48 = vpop.eup %714  ;;  %v546_v27 = vmul.f32 %v713_v4, %v509_v24 }
 0x11a   : > { %v564_v25 = vadd.f32 %v563_v51, %v562_v15  ;;  %v717_v60 = vpop.eup %716  ;;  %v569_v6 = vsel %vm310_vm0, %v545_v58, 0.0  ;;  %v547_v28 = vmul.f32 %v715_v48, %v514_v10 }
 0x11b   : > { %v719_v61 = vpop.eup %718  ;;  %v571_v3 = vsel %vm310_vm0, %v546_v27, 0.0  ;;  %v548_v8 = vmul.f32 %v717_v60, %v519_v9 }
 0x11c   : > { %v566_v7 = vadd.f32 %v565_v50, %v564_v25  ;;  %v721_v62 = vpop.eup %720  ;;  %v573_v54 = vsel %vm310_vm0, %v547_v28, 0.0  ;;  %v549_v2 = vmul.f32 %v719_v61, %v524_v12 }
 0x11d   : > { %v723_v19 = vpop.eup %722  ;;  %v575_v56 = vsel %vm310_vm0, %v548_v8, 0.0  ;;  %v550_v16 = vmul.f32 %v721_v62, %v529_v57 }
 0x11e   : > { %v568_v53 = vadd.f32 %v567_v0, %v566_v7  ;;  %v577_v11 = vsel %vm310_vm0, %v549_v2, 0.0  ;;  %v551_v5 = vmul.f32 %v723_v19, %v534_v13 }
 0x11f   : > { %v579_v26 = vsel %vm310_vm0, %v550_v16, 0.0 }
 0x120   : > { %v570_v21 = vadd.f32 %v569_v6, %v568_v53  ;;  %v581_v52 = vsel %vm310_vm0, %v551_v5, 0.0 }
 0x122   : > { %v572_v14 = vadd.f32 %v571_v3, %v570_v21 }
 0x124   : > { %v574_v49 = vadd.f32 %v573_v54, %v572_v14 }
 0x126   : > { %v576_v23 = vadd.f32 %v575_v56, %v574_v49 }
 0x128   : > { %v578_v22 = vadd.f32 %v577_v11, %v576_v23 }
 0x12a   : > { %v580_v63 = vadd.f32 %v579_v26, %v578_v22 }
 0x12c   : > { %v582_v1 = vadd.f32 %v581_v52, %v580_v63 }
 0x12e   : > { %v583_v55 = vrot.slane %v582_v1, 4 }
 0x130   : > { %v584_v18 = vadd.f32 %v583_v55, %v582_v1 }
 0x132   : > { %v585_v20 = vrot.slane %v584_v18, 2 }
 0x134   : > { %v586_v17 = vadd.f32 %v585_v20, %v584_v18  ;;  %75 = sbr.rel (!%p73_p0) target bundleno = 22 (0x16), region = 59 }
 0x136   : > { %v587_v24 = vrot.slane %v586_v17, 1 }
 0x138   : > { %v588_v15 = vadd.f32 %v587_v24, %v586_v17 }
 0x13a   : > { %591 = vst.msk [vmem:[%s589_s28] sm:$0x1] %vm590_vm1, %v588_v15 }
 0x13b   :  { %735 = shalt.err (!%p732_p5)
}
 0x13c   :  { %s736_s10 = scalar_lea.hbm %s1267_s6, 32 }
 0x13d   :  { %p737_p6 = scmp.ne.s32.totalorder %s1267_s6, %s736_s10  ;;  %p740_p7 = scmp.lt.u32.totalorder %s736_s10, %s1267_s6 }
 0x13f   :  { %p742_p8 = pnand %p740_p7, %p737_p6 }
 0x141   :  { %745 = shalt.err (!%p742_p8)
}
 0x142   :  { %s758_s0 = smov 16   ;;  %s759_s1 = smov 1  }
 0x143   :  { %605 = dma.vmem_to_hbm [thread:$0]  %s600_s30, 32, %s1267_s6, [#allocation3], %s758_s0, %s758_s0, %s759_s1  }
 0x144   :  { %750 = dma.done.wait [#allocation3], 32  }
 0x145   :  { %751 = vsyncadd [#allocation3], 4294967264 }
 0x146   :  { %611 = vsyncpa [#allocation3], 1 }

// kernel: tpu_custom_call.1
= control target key start
LH: loop header
LB: loop body
LE: loop exit
PB: predicated region body
PF: predicated region fallthrough
CT: control target
= control target key end

     0   :  { %v1172_v3 = vmov 0   ;;  %s1817_s0 = inlined_call_operand.vmem [shape: f32[2,128,1], index: 0, kind: input, shape index: {}]   ;;  %s1818_s1 = inlined_call_operand.vmem [shape: f32[16,256], index: 1, kind: input, shape index: {}]   ;;  %s1819_s2 = inlined_call_operand.vmem [shape: f32[128,128], index: 2, kind: input, shape index: {}]   ;;  %s1820_s3 = inlined_call_operand.vmem [shape: f32[128,1], index: 3, kind: input, shape index: {}]   ;;  %s1821_s4 = inlined_call_operand.vmem [shape: f32[128,1], index: 4, kind: input, shape index: {}]   ;;  %s1822_s5 = inlined_call_operand.vmem [shape: f32[2,128,16], index: 5, kind: output, shape index: {0}]   ;;  %s1823_s6 = inlined_call_operand.hbm [shape: f32[2,1,16], index: 6, kind: output, shape index: {1}]  }
   0x1   :  { %v41_v0 = vld [vmem:[%s1820_s3 + $0x10] sm:$0xff]  ;;  %v39_v1 = vld [vmem:[%s1820_s3] sm:$0xff]  ;;  %1083 = vset.pattern.permute.xlu1 %v1172_v3  ;;  %1082 = vset.pattern.permute.xlu0 %v1172_v3  ;;  %v578_v5 = vld [vmem:[%s1818_s1 + $0x8] sm:$0xff] }
   0x2   :  { %v71_v2 = vld [vmem:[%s1818_s1] sm:$0xff]  ;;  %v72_v4 = vld [vmem:[%s1818_s1 + $0x10] sm:$0xff]  ;;  %v579_v6 = vld [vmem:[%s1818_s1 + $0x18] sm:$0xff]  ;;  %85 = vperm.xlu1 %1083, %v41_v0   ;;  %75 = vperm.xlu0 %1082, %v39_v1  }
   0x3   :  { %v1070_v7 = vpack.c.bf16 %v72_v4, %v71_v2  ;;  %v1074_v8 = vpack.c.bf16 %v579_v6, %v578_v5  ;;  %v42_v9 = vld [vmem:[%s1820_s3 + $0x18] sm:$0xff]  ;;  %v40_v10 = vld [vmem:[%s1820_s3 + $0x8] sm:$0xff]  ;;  %v23_v11 = vld [vmem:[%s1819_s2] sm:$0xff] }
   0x4   :  { %v44_v12 = vld [vmem:[%s1820_s3 + $0x28] sm:$0xff]  ;;  %v43_v13 = vld [vmem:[%s1820_s3 + $0x20] sm:$0xff]  ;;  %1018 = vmatprep.mubr.f32.mxu0 %v23_v11  ;;  %1046 = vmatprep.mubr.f32.mxu1 %v23_v11  ;;  %v25_v15 = vld [vmem:[%s1819_s2 + $0x10] sm:$0xff] }
   0x5   :  { %1071 = vmatprep.subr.bf16.mxu0 %v1070_v7  ;;  %1075 = vmatprep.subr.bf16.mxu1 %v1074_v8  ;;  %v24_v14 = vld [vmem:[%s1819_s2 + $0x8] sm:$0xff]  ;;  %v46_v16 = vld [vmem:[%s1820_s3 + $0x38] sm:$0xff]  ;;  %v45_v17 = vld [vmem:[%s1820_s3 + $0x30] sm:$0xff] }
   0x6   :  { %1073 = vmatpush3.bf16.xpose.msra.mxu0 %v1070_v7  ;;  %1077 = vmatpush3.bf16.xpose.msra.mxu1 %v1074_v8  ;;  %v26_v18 = vld [vmem:[%s1819_s2 + $0x18] sm:$0xff]  ;;  %v27_v19 = vld [vmem:[%s1819_s2 + $0x20] sm:$0xff]  ;;  %v48_v20 = vld [vmem:[%s1820_s3 + $0x48] sm:$0xff] }
   0x7   :  { %90 = vperm.xlu1 %1083, %v42_v9   ;;  %80 = vperm.xlu0 %1082, %v40_v10   ;;  %v47_v21 = vld [vmem:[%s1820_s3 + $0x40] sm:$0xff]  ;;  %v28_v22 = vld [vmem:[%s1819_s2 + $0x28] sm:$0xff]  ;;  %v29_v23 = vld [vmem:[%s1819_s2 + $0x30] sm:$0xff] }
   0x8   :  { %v50_v24 = vld [vmem:[%s1820_s3 + $0x58] sm:$0xff]  ;;  %v49_v25 = vld [vmem:[%s1820_s3 + $0x50] sm:$0xff]  ;;  %v31_v27 = vld [vmem:[%s1819_s2 + $0x40] sm:$0xff] }
   0x9   :  { %v30_v26 = vld [vmem:[%s1819_s2 + $0x38] sm:$0xff]  ;;  %v52_v28 = vld [vmem:[%s1820_s3 + $0x68] sm:$0xff]  ;;  %v51_v29 = vld [vmem:[%s1820_s3 + $0x60] sm:$0xff] }
   0xa   :  { %v32_v30 = vld [vmem:[%s1819_s2 + $0x48] sm:$0xff]  ;;  %v33_v31 = vld [vmem:[%s1819_s2 + $0x50] sm:$0xff]  ;;  %v54_v32 = vld [vmem:[%s1820_s3 + $0x78] sm:$0xff] }
   0xb   :  { %100 = vperm.xlu1 %1083, %v44_v12   ;;  %95 = vperm.xlu0 %1082, %v43_v13   ;;  %v53_v33 = vld [vmem:[%s1820_s3 + $0x70] sm:$0xff] }
   0xd   :  { %1019 = vmatmul.mubr.f32.vlgmr.msra.gmra.mrb[0].mxu0 %v24_v14  ;;  %1047 = vmatmul.mubr.f32.vlgmr.msra.gmra.mrb[0].mxu1 %v24_v14 }
   0xe   :  { %1021 = vmatprep.mubr.f32.mxu0 %v25_v15  ;;  %1049 = vmatprep.mubr.f32.mxu1 %v25_v15 }
   0xf   :  { %110 = vperm.xlu1 %1083, %v46_v16   ;;  %105 = vperm.xlu0 %1082, %v45_v17  }
  0x11   :  { %1022 = vmatmul.mubr.f32.gmra.mrb[2].mxu0 %v26_v18  ;;  %1050 = vmatmul.mubr.f32.gmra.mrb[2].mxu1 %v26_v18 }
  0x12   :  { %1024 = vmatprep.mubr.f32.mxu0 %v27_v19  ;;  %1052 = vmatprep.mubr.f32.mxu1 %v27_v19 }
  0x13   :  { %120 = vperm.xlu1 %1083, %v48_v20   ;;  %115 = vperm.xlu0 %1082, %v47_v21  }
  0x15   :  { %1025 = vmatmul.mubr.f32.gmra.mrb[4].mxu0 %v28_v22  ;;  %1053 = vmatmul.mubr.f32.gmra.mrb[4].mxu1 %v28_v22 }
  0x16   :  { %1027 = vmatprep.mubr.f32.mxu0 %v29_v23  ;;  %1055 = vmatprep.mubr.f32.mxu1 %v29_v23 }
  0x17   :  { %130 = vperm.xlu1 %1083, %v50_v24   ;;  %125 = vperm.xlu0 %1082, %v49_v25  }
  0x19   :  { %1028 = vmatmul.mubr.f32.gmra.mrb[6].mxu0 %v30_v26  ;;  %1056 = vmatmul.mubr.f32.gmra.mrb[6].mxu1 %v30_v26 }
  0x1a   :  { %1030 = vmatprep.mubr.f32.mxu0 %v31_v27  ;;  %1058 = vmatprep.mubr.f32.mxu1 %v31_v27 }
  0x1b   :  { %140 = vperm.xlu1 %1083, %v52_v28   ;;  %135 = vperm.xlu0 %1082, %v51_v29  }
  0x1d   :  { %1031 = vmatmul.mubr.f32.gmra.mrb[8].mxu0 %v32_v30  ;;  %1059 = vmatmul.mubr.f32.gmra.mrb[8].mxu1 %v32_v30 }
  0x1e   :  { %12 = vsyncpa [#allocation3], 0  ;;  %1033 = vmatprep.mubr.f32.mxu0 %v33_v31  ;;  %1061 = vmatprep.mubr.f32.mxu1 %v33_v31  ;;  %v34_v34 = vld [vmem:[%s1819_s2 + $0x58] sm:$0xff]  ;;  %v35_v35 = vld [vmem:[%s1819_s2 + $0x60] sm:$0xff]  ;;  %vm298_vm0 = vcmask 130048   ;;  %vm576_vm1 = vcmask 122880  }
  0x1f   :  { %150 = vperm.xlu1 %1083, %v54_v32   ;;  %145 = vperm.xlu0 %1082, %v53_v33   ;;  %v316_v36 = vld [vmem:[%s1817_s0 + $0x8] sm:$0xff]  ;;  %v315_v37 = vld [vmem:[%s1817_s0] sm:$0xff]  ;;  %v37_v39 = vld [vmem:[%s1819_s2 + $0x70] sm:$0xff] }
  0x20   :  { %v36_v38 = vld [vmem:[%s1819_s2 + $0x68] sm:$0xff]  ;;  %v318_v40 = vld [vmem:[%s1817_s0 + $0x18] sm:$0xff]  ;;  %v317_v41 = vld [vmem:[%s1817_s0 + $0x10] sm:$0xff] }
  0x21   :  { %1034 = vmatmul.mubr.f32.gmra.mrb[10].mxu0 %v34_v34  ;;  %1062 = vmatmul.mubr.f32.gmra.mrb[10].mxu1 %v34_v34  ;;  %v38_v42 = vld [vmem:[%s1819_s2 + $0x78] sm:$0xff]  ;;  %v320_v43 = vld [vmem:[%s1817_s0 + $0x28] sm:$0xff]  ;;  %v319_v44 = vld [vmem:[%s1817_s0 + $0x20] sm:$0xff] }
  0x22   :  { %1036 = vmatprep.mubr.f32.mxu0 %v35_v35  ;;  %1064 = vmatprep.mubr.f32.mxu1 %v35_v35  ;;  %v322_v45 = vld [vmem:[%s1817_s0 + $0x38] sm:$0xff]  ;;  %v321_v46 = vld [vmem:[%s1817_s0 + $0x30] sm:$0xff]  ;;  %v324_v47 = vld [vmem:[%s1817_s0 + $0x48] sm:$0xff] }
  0x23   :  { %338 = vperm.xlu1 %1083, %v316_v36   ;;  %333 = vperm.xlu0 %1082, %v315_v37   ;;  %v323_v48 = vld [vmem:[%s1817_s0 + $0x40] sm:$0xff]  ;;  %v326_v49 = vld [vmem:[%s1817_s0 + $0x58] sm:$0xff]  ;;  %v325_v50 = vld [vmem:[%s1817_s0 + $0x50] sm:$0xff] }
  0x24   :  { %v328_v51 = vld [vmem:[%s1817_s0 + $0x68] sm:$0xff]  ;;  %v327_v52 = vld [vmem:[%s1817_s0 + $0x60] sm:$0xff]  ;;  %v330_v53 = vld [vmem:[%s1817_s0 + $0x78] sm:$0xff] }
  0x25   :  { %1037 = vmatmul.mubr.f32.gmra.mrb[12].mxu0 %v36_v38  ;;  %1065 = vmatmul.mubr.f32.gmra.mrb[12].mxu1 %v36_v38  ;;  %v329_v54 = vld [vmem:[%s1817_s0 + $0x70] sm:$0xff]  ;;  %v962_v55 = vld [vmem:[%s1817_s0 + $0x80] sm:$0xff]  ;;  %v963_v58 = vld [vmem:[%s1817_s0 + $0x88] sm:$0xff] }
  0x26   :  { %1039 = vmatprep.mubr.f32.mxu0 %v37_v39  ;;  %1067 = vmatprep.mubr.f32.mxu1 %v37_v39  ;;  %v55_v56 = vld [vmem:[%s1821_s4] sm:$0xff]  ;;  %v964_v57 = vld [vmem:[%s1817_s0 + $0x90] sm:$0xff]  ;;  %v965_v60 = vld [vmem:[%s1817_s0 + $0x98] sm:$0xff] }
  0x27   :  { %348 = vperm.xlu1 %1083, %v318_v40   ;;  %343 = vperm.xlu0 %1082, %v317_v41   ;;  %v966_v59 = vld [vmem:[%s1817_s0 + $0xa0] sm:$0xff]  ;;  %v968_v61 = vld [vmem:[%s1817_s0 + $0xb0] sm:$0xff]  ;;  %v967_v62 = vld [vmem:[%s1817_s0 + $0xa8] sm:$0xff] }
  0x28   :  { %v56_v63 = vld [vmem:[%s1821_s4 + $0x8] sm:$0xff]  ;;  %v969_v0 = vld [vmem:[%s1817_s0 + $0xb8] sm:$0xff]  ;;  %v57_v1 = vld [vmem:[%s1821_s4 + $0x10] sm:$0xff] }
  0x29   :  { %1040 = vmatmul.mubr.f32.gmra.mrb[14].mxu0 %v38_v42  ;;  %1068 = vmatmul.mubr.f32.gmra.mrb[14].mxu1 %v38_v42  ;;  %v970_v2 = vld [vmem:[%s1817_s0 + $0xc0] sm:$0xff]  ;;  %v58_v3 = vld [vmem:[%s1821_s4 + $0x18] sm:$0xff]  ;;  %v971_v4 = vld [vmem:[%s1817_s0 + $0xc8] sm:$0xff] }
  0x2a   :  { %v59_v5 = vld [vmem:[%s1821_s4 + $0x20] sm:$0xff]  ;;  %v972_v6 = vld [vmem:[%s1817_s0 + $0xd0] sm:$0xff]  ;;  %v60_v7 = vld [vmem:[%s1821_s4 + $0x28] sm:$0xff] }
  0x2b   :  { %358 = vperm.xlu1 %1083, %v320_v43   ;;  %353 = vperm.xlu0 %1082, %v319_v44   ;;  %v973_v8 = vld [vmem:[%s1817_s0 + $0xd8] sm:$0xff]  ;;  %v61_v9 = vld [vmem:[%s1821_s4 + $0x30] sm:$0xff]  ;;  %v974_v10 = vld [vmem:[%s1817_s0 + $0xe0] sm:$0xff] }
  0x2c   :  { %v62_v11 = vld [vmem:[%s1821_s4 + $0x38] sm:$0xff]  ;;  %v975_v12 = vld [vmem:[%s1817_s0 + $0xe8] sm:$0xff]  ;;  %v63_v13 = vld [vmem:[%s1821_s4 + $0x40] sm:$0xff] }
  0x2d   :  { %v976_v14 = vld [vmem:[%s1817_s0 + $0xf0] sm:$0xff]  ;;  %v64_v15 = vld [vmem:[%s1821_s4 + $0x48] sm:$0xff]  ;;  %v977_v16 = vld [vmem:[%s1817_s0 + $0xf8] sm:$0xff] }
  0x2e   :  { %v66_v17 = vld [vmem:[%s1821_s4 + $0x58] sm:$0xff]  ;;  %v65_v18 = vld [vmem:[%s1821_s4 + $0x50] sm:$0xff]  ;;  %v68_v19 = vld [vmem:[%s1821_s4 + $0x68] sm:$0xff] }
  0x2f   :  { %368 = vperm.xlu1 %1083, %v322_v45   ;;  %363 = vperm.xlu0 %1082, %v321_v46   ;;  %v67_v20 = vld [vmem:[%s1821_s4 + $0x60] sm:$0xff]  ;;  %v70_v21 = vld [vmem:[%s1821_s4 + $0x78] sm:$0xff]  ;;  %v69_v22 = vld [vmem:[%s1821_s4 + $0x70] sm:$0xff] }
  0x33   :  { %378 = vperm.xlu1 %1083, %v324_v47   ;;  %373 = vperm.xlu0 %1082, %v323_v48  }
  0x37   :  { %388 = vperm.xlu1 %1083, %v326_v49   ;;  %383 = vperm.xlu0 %1082, %v325_v50  }
  0x3b   :  { %398 = vperm.xlu1 %1083, %v328_v51   ;;  %393 = vperm.xlu0 %1082, %v327_v52  }
  0x3f   :  { %408 = vperm.xlu1 %1083, %v330_v53   ;;  %403 = vperm.xlu0 %1082, %v329_v54  }
  0x43   :  { %761 = vperm.xlu1 %1083, %v962_v55   ;;  %445 = vperm.xlu0 %1082, %v55_v56  }
  0x47   :  { %771 = vperm.xlu1 %1083, %v964_v57   ;;  %766 = vperm.xlu0 %1082, %v963_v58  }
  0x4b   :  { %781 = vperm.xlu1 %1083, %v966_v59   ;;  %776 = vperm.xlu0 %1082, %v965_v60  }
  0x4f   :  { %791 = vperm.xlu1 %1083, %v968_v61   ;;  %786 = vperm.xlu0 %1082, %v967_v62  }
  0x53   :  { %450 = vperm.xlu1 %1083, %v56_v63   ;;  %796 = vperm.xlu0 %1082, %v969_v0  }
  0x57   :  { %455 = vperm.xlu1 %1083, %v57_v1   ;;  %801 = vperm.xlu0 %1082, %v970_v2  }
  0x5b   :  { %460 = vperm.xlu1 %1083, %v58_v3   ;;  %806 = vperm.xlu0 %1082, %v971_v4  }
  0x5f   :  { %465 = vperm.xlu1 %1083, %v59_v5   ;;  %811 = vperm.xlu0 %1082, %v972_v6  }
  0x63   :  { %470 = vperm.xlu1 %1083, %v60_v7   ;;  %816 = vperm.xlu0 %1082, %v973_v8  }
  0x67   :  { %475 = vperm.xlu1 %1083, %v61_v9   ;;  %821 = vperm.xlu0 %1082, %v974_v10  }
  0x6b   :  { %480 = vperm.xlu1 %1083, %v62_v11   ;;  %826 = vperm.xlu0 %1082, %v975_v12  }
  0x6f   :  { %485 = vperm.xlu1 %1083, %v63_v13   ;;  %831 = vperm.xlu0 %1082, %v976_v14  }
  0x73   :  { %490 = vperm.xlu1 %1083, %v64_v15   ;;  %836 = vperm.xlu0 %1082, %v977_v16  }
  0x77   :  { %500 = vperm.xlu1 %1083, %v66_v17   ;;  %495 = vperm.xlu0 %1082, %v65_v18  }
  0x7b   :  { %510 = vperm.xlu1 %1083, %v68_v19   ;;  %505 = vperm.xlu0 %1082, %v67_v20  }
  0x7f   :  { %520 = vperm.xlu1 %1083, %v70_v21   ;;  %515 = vperm.xlu0 %1082, %v69_v22  }
  0x81   :  { %v1463_v23 = vpop.permute.xlu1 %85  ;;  %v76_v24 = vpop.permute.xlu0 %75 }
  0x86   :  { %v1465_v25 = vpop.permute.xlu1 %90  ;;  %v81_v26 = vpop.permute.xlu0 %80 }
  0x8a   :  { %v1467_v27 = vpop.permute.xlu1 %100  ;;  %v1469_v28 = vpop.permute.xlu0 %95 }
  0x8e   :  { %v1471_v29 = vpop.permute.xlu1 %110  ;;  %v1473_v30 = vpop.permute.xlu0 %105 }
  0x92   :  { %v1475_v31 = vpop.permute.xlu1 %120  ;;  %v1477_v32 = vpop.permute.xlu0 %115 }
  0x96   :  { %v1479_v33 = vpop.permute.xlu1 %130  ;;  %v1481_v34 = vpop.permute.xlu0 %125 }
  0x9a   :  { %v1483_v35 = vpop.permute.xlu1 %140  ;;  %v1485_v36 = vpop.permute.xlu0 %135 }
  0x9e   :  { %v1487_v37 = vpop.permute.xlu1 %150  ;;  %v1489_v38 = vpop.permute.xlu0 %145 }
  0xa2   :  { %v339_v39 = vpop.permute.xlu1 %338  ;;  %v334_v40 = vpop.permute.xlu0 %333 }
  0xa6   :  { %v349_v41 = vpop.permute.xlu1 %348  ;;  %v1491_v42 = vpop.permute.xlu0 %343 }
  0xaa   :  { %v1493_v43 = vpop.permute.xlu1 %358  ;;  %v1495_v44 = vpop.permute.xlu0 %353 }
  0xae   :  { %v1497_v45 = vpop.permute.xlu1 %368  ;;  %v1499_v46 = vpop.permute.xlu0 %363 }
  0xb2   :  { %v1501_v47 = vpop.permute.xlu1 %378  ;;  %v1503_v48 = vpop.permute.xlu0 %373 }
  0xb6   :  { %v1505_v49 = vpop.permute.xlu1 %388  ;;  %v1507_v50 = vpop.permute.xlu0 %383 }
  0xba   :  { %v1509_v51 = vpop.permute.xlu1 %398  ;;  %v1511_v52 = vpop.permute.xlu0 %393 }
  0xbe   :  { %v1513_v53 = vpop.permute.xlu1 %408  ;;  %v1515_v54 = vpop.permute.xlu0 %403 }
  0xc2   :  { %v762_v55 = vpop.permute.xlu1 %761  ;;  %v1517_v56 = vpop.permute.xlu0 %445 }
  0xc6   :  { %v772_v57 = vpop.permute.xlu1 %771  ;;  %v767_v58 = vpop.permute.xlu0 %766 }
  0xca   :  { %v1519_v59 = vpop.permute.xlu1 %781  ;;  %v777_v60 = vpop.permute.xlu0 %776 }
  0xce   :  { %v1521_v61 = vpop.permute.xlu1 %791  ;;  %v1523_v62 = vpop.permute.xlu0 %786 }
  0xd2   :  { %v1525_v63 = vpop.permute.xlu1 %450  ;;  %v1527_v0 = vpop.permute.xlu0 %796 }
  0xd6   :  { %v1529_v1 = vpop.permute.xlu1 %455  ;;  %v1531_v2 = vpop.permute.xlu0 %801 }
  0xda   :  { %v1533_v3 = vpop.permute.xlu1 %460  ;;  %v1535_v4 = vpop.permute.xlu0 %806 }
  0xde   :  { %v1537_v5 = vpop.permute.xlu1 %465  ;;  %v1539_v6 = vpop.permute.xlu0 %811 }
  0xe0   :  { %v1020_v7 = vpop.f32.mrb[0].mxu0  ;;  %v1048_v8 = vpop.f32.mrb[0].mxu1 }
  0xe1   :  { %v225_v9 = vadd.f32 %v1020_v7, %v81_v26  ;;  %v652_v10 = vadd.f32 %v1048_v8, %v81_v26  ;;  %v219_v11 = vpop.f32.mrb[1].mxu0  ;;  %v646_v12 = vpop.f32.mrb[1].mxu1 }
  0xe2   :  { %v220_v13 = vadd.f32 %v219_v11, %v76_v24  ;;  %v647_v14 = vadd.f32 %v646_v12, %v76_v24  ;;  %v1549_v17 = vpop.permute.xlu1 %470  ;;  %v1563_v7 = vpop.permute.xlu0 %816 }
  0xe3   :  { %300 = vst.msk [vmem:[%s1822_s5 + $0x8] sm:$0xff] %vm298_vm0, %v225_v9  ;;  %v412_v15 = vadd.f32 %v339_v39, %v225_v9  ;;  %947 = vst.msk [vmem:[%s1822_s5 + $0x88] sm:$0xff] %vm298_vm0, %v652_v10  ;;  %v840_v16 = vadd.f32 %v767_v58, %v652_v10 }
  0xe4   :  { %299 = vst.msk [vmem:[%s1822_s5] sm:$0xff] %vm298_vm0, %v220_v13  ;;  %v411_v18 = vadd.f32 %v334_v40, %v220_v13  ;;  %946 = vst.msk [vmem:[%s1822_s5 + $0x80] sm:$0xff] %vm298_vm0, %v647_v14  ;;  %v839_v19 = vadd.f32 %v762_v55, %v647_v14  ;;  %v1023_v20 = vpop.f32.mrb[2].mxu0  ;;  %v1051_v21 = vpop.f32.mrb[2].mxu1 }
  0xe5   :  { %1084 = vtanh.f32 %v412_v15  ;;  %v235_v22 = vadd.f32 %v1023_v20, %v1465_v25  ;;  %v662_v24 = vadd.f32 %v1051_v21, %v1465_v25  ;;  %v229_v26 = vpop.f32.mrb[3].mxu0  ;;  %v656_v39 = vpop.f32.mrb[3].mxu1 }
  0xe6   :  { %1086 = vtanh.f32 %v840_v16  ;;  %v230_v58 = vadd.f32 %v229_v26, %v1463_v23  ;;  %v657_v40 = vadd.f32 %v656_v39, %v1463_v23  ;;  %v1586_v14 = vpop.permute.xlu1 %475 }
  0xe7   :  { %1088 = vtanh.f32 %v411_v18  ;;  %302 = vst.msk [vmem:[%s1822_s5 + $0x18] sm:$0xff] %vm298_vm0, %v235_v22  ;;  %v414_v55 = vadd.f32 %v349_v41, %v235_v22  ;;  %949 = vst.msk [vmem:[%s1822_s5 + $0x98] sm:$0xff] %vm298_vm0, %v662_v24  ;;  %v842_v25 = vadd.f32 %v777_v60, %v662_v24  ;;  %v1612_v24 = vpop.permute.xlu0 %821 }
  0xe8   :  { %1090 = vtanh.f32 %v839_v19  ;;  %301 = vst.msk [vmem:[%s1822_s5 + $0x10] sm:$0xff] %vm298_vm0, %v230_v58  ;;  %v413_v23 = vadd.f32 %v1491_v42, %v230_v58  ;;  %948 = vst.msk [vmem:[%s1822_s5 + $0x90] sm:$0xff] %vm298_vm0, %v657_v40  ;;  %v841_v41 = vadd.f32 %v772_v57, %v657_v40  ;;  %v1026_v8 = vpop.f32.mrb[4].mxu0  ;;  %v1054_v9 = vpop.f32.mrb[4].mxu1 }
  0xe9   :  { %1092 = vtanh.f32 %v414_v55  ;;  %v245_v10 = vadd.f32 %v1026_v8, %v1467_v27  ;;  %v672_v60 = vadd.f32 %v1054_v9, %v1467_v27  ;;  %v239_v11 = vpop.f32.mrb[5].mxu0  ;;  %v666_v12 = vpop.f32.mrb[5].mxu1 }
  0xea   :  { %1094 = vtanh.f32 %v842_v25  ;;  %v240_v13 = vadd.f32 %v239_v11, %v1469_v28  ;;  %v667_v42 = vadd.f32 %v666_v12, %v1469_v28  ;;  %v1643_v12 = vpop.permute.xlu1 %480 }
  0xeb   :  { %1096 = vtanh.f32 %v413_v23  ;;  %304 = vst.msk [vmem:[%s1822_s5 + $0x28] sm:$0xff] %vm298_vm0, %v245_v10  ;;  %v416_v57 = vadd.f32 %v1493_v43, %v245_v10  ;;  %951 = vst.msk [vmem:[%s1822_s5 + $0xa8] sm:$0xff] %vm298_vm0, %v672_v60  ;;  %v844_v27 = vadd.f32 %v1523_v62, %v672_v60 }
  0xec   :  { %1098 = vtanh.f32 %v841_v41  ;;  %303 = vst.msk [vmem:[%s1822_s5 + $0x20] sm:$0xff] %vm298_vm0, %v240_v13  ;;  %v415_v28 = vadd.f32 %v1495_v44, %v240_v13  ;;  %950 = vst.msk [vmem:[%s1822_s5 + $0xa0] sm:$0xff] %vm298_vm0, %v667_v42  ;;  %v843_v43 = vadd.f32 %v1519_v59, %v667_v42  ;;  %v1029_v15 = vpop.f32.mrb[6].mxu0  ;;  %v1057_v16 = vpop.f32.mrb[6].mxu1 }
  0xed   :  { %1100 = vtanh.f32 %v416_v57  ;;  %v255_v62 = vadd.f32 %v1029_v15, %v1471_v29  ;;  %v682_v18 = vadd.f32 %v1057_v16, %v1471_v29  ;;  %v249_v19 = vpop.f32.mrb[7].mxu0  ;;  %v676_v20 = vpop.f32.mrb[7].mxu1 }
  0xee   :  { %1102 = vtanh.f32 %v844_v27  ;;  %v250_v21 = vadd.f32 %v249_v19, %v1473_v30  ;;  %v677_v44 = vadd.f32 %v676_v20, %v1473_v30 }
  0xef   :  { %v1085_v22 = vpop.eup %1084  ;;  %1104 = vtanh.f32 %v415_v28  ;;  %306 = vst.msk [vmem:[%s1822_s5 + $0x38] sm:$0xff] %vm298_vm0, %v255_v62  ;;  %v418_v59 = vadd.f32 %v1497_v45, %v255_v62  ;;  %953 = vst.msk [vmem:[%s1822_s5 + $0xb8] sm:$0xff] %vm298_vm0, %v682_v18  ;;  %v846_v29 = vadd.f32 %v1527_v0, %v682_v18 }
  0xf0   :  { %v1087_v26 = vpop.eup %1086  ;;  %v524_v30 = vmul.f32 %v1085_v22, %v1525_v63  ;;  %1106 = vtanh.f32 %v843_v43  ;;  %305 = vst.msk [vmem:[%s1822_s5 + $0x30] sm:$0xff] %vm298_vm0, %v250_v21  ;;  %v417_v39 = vadd.f32 %v1499_v46, %v250_v21  ;;  %952 = vst.msk [vmem:[%s1822_s5 + $0xb0] sm:$0xff] %vm298_vm0, %v677_v44  ;;  %v845_v45 = vadd.f32 %v1521_v61, %v677_v44  ;;  %v1032_v58 = vpop.f32.mrb[8].mxu0 }
  0xf1   :  { %v1060_v0 = vpop.f32.mrb[8].mxu1  ;;  %v1089_v40 = vpop.eup %1088  ;;  %v872_v55 = vmul.f32 %v1087_v26, %v1525_v63  ;;  %1108 = vtanh.f32 %v418_v59  ;;  %v265_v25 = vadd.f32 %v1032_v58, %v1475_v31 }
  0xf2   :  { %v692_v23 = vadd.f32 %v1060_v0, %v1475_v31  ;;  %v259_v41 = vpop.f32.mrb[9].mxu0  ;;  %v686_v8 = vpop.f32.mrb[9].mxu1  ;;  %v540_v9 = vsel %vm298_vm0, %v524_v30, 0.0  ;;  %v523_v10 = vmul.f32 %v1089_v40, %v1517_v56  ;;  %1110 = vtanh.f32 %v846_v29 }
  0xf3   :  { %v1091_v46 = vpop.eup %1090  ;;  %v260_v61 = vadd.f32 %v259_v41, %v1477_v32  ;;  %v888_v11 = vsel %vm298_vm0, %v872_v55, 0.0  ;;  %1112 = vtanh.f32 %v417_v39  ;;  %308 = vst.msk [vmem:[%s1822_s5 + $0x48] sm:$0xff] %vm298_vm0, %v265_v25  ;;  %v420_v31 = vadd.f32 %v1501_v47, %v265_v25  ;;  %v1669_v22 = vpop.permute.xlu0 %826 }
  0xf4   :  { %v1093_v60 = vpop.eup %1092  ;;  %v871_v63 = vmul.f32 %v1091_v46, %v1517_v56  ;;  %955 = vst.msk [vmem:[%s1822_s5 + $0xc8] sm:$0xff] %vm298_vm0, %v692_v23  ;;  %v539_v42 = vsel %vm298_vm0, %v523_v10, 0.0  ;;  %1114 = vtanh.f32 %v845_v45  ;;  %v848_v57 = vadd.f32 %v1535_v4, %v692_v23  ;;  %v1035_v27 = vpop.f32.mrb[10].mxu0 }
  0xf5   :  { %v1095_v13 = vpop.eup %1094  ;;  %v526_v56 = vmul.f32 %v1093_v60, %v1533_v3  ;;  %307 = vst.msk [vmem:[%s1822_s5 + $0x40] sm:$0xff] %vm298_vm0, %v260_v61  ;;  %v1063_v47 = vpop.f32.mrb[10].mxu1  ;;  %v541_v43 = vadd.f32 %v540_v9, %v539_v42  ;;  %1116 = vtanh.f32 %v420_v31  ;;  %v419_v59 = vadd.f32 %v1503_v48, %v260_v61 }
  0xf6   :  { %v1097_v28 = vpop.eup %1096  ;;  %v887_v15 = vsel %vm298_vm0, %v871_v63, 0.0  ;;  %v1662_v16 = vpop.f32.mrb[11].mxu0  ;;  %1118 = vtanh.f32 %v848_v57  ;;  %v874_v21 = vmul.f32 %v1095_v13, %v1533_v3  ;;  %v687_v29 = vadd.f32 %v686_v8, %v1477_v32 }
  0xf7   :  { %v1664_v62 = vpop.f32.mrb[11].mxu1  ;;  %v1099_v18 = vpop.eup %1098  ;;  %v889_v19 = vadd.f32 %v888_v11, %v887_v15  ;;  %v525_v4 = vmul.f32 %v1097_v28, %v1529_v1  ;;  %v544_v30 = vsel %vm298_vm0, %v526_v56, 0.0  ;;  %v275_v45 = vadd.f32 %v1035_v27, %v1479_v33 }
  0xf8   :  { %v1101_v20 = vpop.eup %1100  ;;  %v873_v44 = vmul.f32 %v1099_v18, %v1529_v1  ;;  %v702_v58 = vadd.f32 %v1063_v47, %v1479_v33  ;;  %v1038_v0 = vpop.f32.mrb[12].mxu0  ;;  %1120 = vtanh.f32 %v419_v59  ;;  %954 = vst.msk [vmem:[%s1822_s5 + $0xc0] sm:$0xff] %vm298_vm0, %v687_v29  ;;  %v847_v9 = vadd.f32 %v1531_v2, %v687_v29 }
  0xf9   :  { %v1103_v26 = vpop.eup %1102  ;;  %v542_v39 = vsel %vm298_vm0, %v525_v4, 0.0  ;;  %v1677_v40 = vpop.f32.mrb[12].mxu1  ;;  %v528_v48 = vmul.f32 %v1101_v20, %v1549_v17  ;;  %310 = vst.msk [vmem:[%s1822_s5 + $0x58] sm:$0xff] %vm298_vm0, %v275_v45  ;;  %v892_v61 = vsel %vm298_vm0, %v874_v21, 0.0  ;;  %v422_v11 = vadd.f32 %v1505_v49, %v275_v45 }
  0xfa   :  { %v1105_v3 = vpop.eup %1104  ;;  %v543_v1 = vadd.f32 %v542_v39, %v541_v43  ;;  %v890_v55 = vsel %vm298_vm0, %v873_v44, 0.0  ;;  %v1685_v32 = vpop.f32.mrb[13].mxu0  ;;  %v876_v41 = vmul.f32 %v1103_v26, %v1549_v17  ;;  %957 = vst.msk [vmem:[%s1822_s5 + $0xd8] sm:$0xff] %vm298_vm0, %v702_v58  ;;  %1122 = vtanh.f32 %v847_v9 }
  0xfb   :  { %v1687_v25 = vpop.f32.mrb[13].mxu1  ;;  %v1107_v33 = vpop.eup %1106  ;;  %v891_v23 = vadd.f32 %v890_v55, %v889_v19  ;;  %v527_v8 = vmul.f32 %v1105_v3, %v1537_v5  ;;  %v548_v47 = vsel %vm298_vm0, %v528_v48, 0.0  ;;  %v850_v20 = vadd.f32 %v1563_v7, %v702_v58 }
  0xfc   :  { %v1691_v46 = vpop.permute.xlu1 %485  ;;  %v1109_v10 = vpop.eup %1108  ;;  %v875_v17 = vmul.f32 %v1107_v33, %v1537_v5  ;;  %v545_v60 = vadd.f32 %v544_v30, %v543_v1  ;;  %v896_v4 = vsel %vm298_vm0, %v876_v41, 0.0  ;;  %1124 = vtanh.f32 %v422_v11 }
  0xfd   :  { %v1111_v63 = vpop.eup %1110  ;;  %v530_v2 = vmul.f32 %v1109_v10, %v1643_v12  ;;  %v546_v31 = vsel %vm298_vm0, %v527_v8, 0.0  ;;  %v893_v13 = vadd.f32 %v892_v61, %v891_v23  ;;  %v1041_v42 = vpop.f32.mrb[14].mxu0  ;;  %1126 = vtanh.f32 %v850_v20 }
  0xfe   :  { %v1069_v56 = vpop.f32.mrb[14].mxu1  ;;  %v1113_v57 = vpop.eup %1112  ;;  %v547_v27 = vadd.f32 %v546_v31, %v545_v60  ;;  %v878_v28 = vmul.f32 %v1111_v63, %v1643_v12  ;;  %v894_v5 = vsel %vm298_vm0, %v875_v17, 0.0  ;;  %v270_v12 = vadd.f32 %v1662_v16, %v1481_v34 }
  0xff   :  { %v289_v43 = vpop.f32.mrb[15].mxu0  ;;  %v1710_v15 = vpop.f32.mrb[15].mxu1  ;;  %v529_v18 = vmul.f32 %v1113_v57, %v1586_v14  ;;  %v895_v19 = vadd.f32 %v894_v5, %v893_v13  ;;  %v552_v45 = vsel %vm298_vm0, %v530_v2, 0.0  ;;  %v697_v48 = vadd.f32 %v1664_v62, %v1481_v34 }
 0x100   :  { %v1115_v49 = vpop.eup %1114  ;;  %v1715_v44 = vpop.permute.xlu0 %831  ;;  %v549_v59 = vadd.f32 %v548_v47, %v547_v27  ;;  %v900_v1 = vsel %vm298_vm0, %v878_v28, 0.0  ;;  %309 = vst.msk [vmem:[%s1822_s5 + $0x50] sm:$0xff] %vm298_vm0, %v270_v12  ;;  %v285_v33 = vadd.f32 %v1038_v0, %v1483_v35  ;;  %v712_v9 = vadd.f32 %v1677_v40, %v1483_v35 }
 0x101   :  { %v1117_v21 = vpop.eup %1116  ;;  %v877_v29 = vmul.f32 %v1115_v49, %v1586_v14  ;;  %v491_v30 = vpop.permute.xlu1 %490  ;;  %v550_v39 = vsel %vm298_vm0, %v529_v18, 0.0  ;;  %v897_v3 = vadd.f32 %v896_v4, %v895_v19  ;;  %v421_v14 = vadd.f32 %v1507_v50, %v270_v12  ;;  %956 = vst.msk [vmem:[%s1822_s5 + $0xd0] sm:$0xff] %vm298_vm0, %v697_v48 }
 0x102   :  { %v1119_v26 = vpop.eup %1118  ;;  %v532_v7 = vmul.f32 %v1117_v21, %v491_v30  ;;  %v551_v58 = vadd.f32 %v550_v39, %v549_v59  ;;  %v849_v50 = vadd.f32 %v1539_v6, %v697_v48  ;;  %312 = vst.msk [vmem:[%s1822_s5 + $0x68] sm:$0xff] %vm298_vm0, %v285_v33  ;;  %v424_v34 = vadd.f32 %v1509_v51, %v285_v33 }
 0x103   :  { %v898_v55 = vsel %vm298_vm0, %v877_v29, 0.0  ;;  %v1121_v23 = vpop.eup %1120  ;;  %v880_v8 = vmul.f32 %v1119_v26, %v491_v30  ;;  %1128 = vtanh.f32 %v421_v14  ;;  %959 = vst.msk [vmem:[%s1822_s5 + $0xe8] sm:$0xff] %vm298_vm0, %v712_v9  ;;  %v852_v35 = vadd.f32 %v1669_v22, %v712_v9 }
 0x104   :  { %v899_v16 = vadd.f32 %v898_v55, %v897_v3  ;;  %v553_v41 = vadd.f32 %v552_v45, %v551_v58  ;;  %v531_v10 = vmul.f32 %v1121_v23, %v1691_v46  ;;  %v837_v62 = vpop.permute.xlu0 %836  ;;  %v280_v0 = vadd.f32 %v1685_v32, %v1485_v36  ;;  %v1123_v17 = vpop.eup %1122 }
 0x105   :  { %v707_v6 = vadd.f32 %v1687_v25, %v1485_v36  ;;  %v295_v40 = vadd.f32 %v1041_v42, %v1487_v37  ;;  %1130 = vtanh.f32 %v849_v50  ;;  %v722_v51 = vadd.f32 %v1069_v56, %v1487_v37  ;;  %v501_v42 = vpop.permute.xlu1 %500 }
 0x106   :  { %v901_v61 = vadd.f32 %v900_v1, %v899_v16  ;;  %v554_v60 = vsel %vm298_vm0, %v531_v10, 0.0  ;;  %v290_v11 = vadd.f32 %v289_v43, %v1489_v38  ;;  %v879_v2 = vmul.f32 %v1123_v17, %v1691_v46  ;;  %311 = vst.msk [vmem:[%s1822_s5 + $0x60] sm:$0xff] %vm298_vm0, %v280_v0 }
 0x107   :  { %v555_v63 = vadd.f32 %v554_v60, %v553_v41  ;;  %1132 = vtanh.f32 %v424_v34  ;;  %v423_v36 = vadd.f32 %v1511_v52, %v280_v0  ;;  %958 = vst.msk [vmem:[%s1822_s5 + $0xe0] sm:$0xff] %vm298_vm0, %v707_v6  ;;  %314 = vst.msk [vmem:[%s1822_s5 + $0x78] sm:$0xff] %vm298_vm0, %v295_v40  ;;  %v556_v37 = vsel %vm298_vm0, %v532_v7, 0.0  ;;  %v1125_v52 = vpop.eup %1124 }
 0x108   :  { %1134 = vtanh.f32 %v852_v35  ;;  %v851_v22 = vadd.f32 %v1612_v24, %v707_v6  ;;  %v426_v32 = vadd.f32 %v1513_v53, %v295_v40  ;;  %961 = vst.msk [vmem:[%s1822_s5 + $0xf8] sm:$0xff] %vm298_vm0, %v722_v51  ;;  %313 = vst.msk [vmem:[%s1822_s5 + $0x70] sm:$0xff] %vm298_vm0, %v290_v11  ;;  %v902_v46 = vsel %vm298_vm0, %v879_v2, 0.0  ;;  %v496_v56 = vpop.permute.xlu0 %495  ;;  %v1127_v27 = vpop.eup %1126 }
 0x109   :  { %v557_v25 = vadd.f32 %v556_v37, %v555_v63  ;;  %1136 = vtanh.f32 %v423_v36  ;;  %v854_v31 = vadd.f32 %v837_v62, %v722_v51  ;;  %v903_v13 = vadd.f32 %v902_v46, %v901_v61  ;;  %v511_v20 = vpop.permute.xlu1 %510 }
 0x10a   :  { %1138 = vtanh.f32 %v851_v22  ;;  %v425_v53 = vadd.f32 %v1515_v54, %v290_v11  ;;  %v904_v24 = vsel %vm298_vm0, %v880_v8, 0.0  ;;  %v717_v57 = vadd.f32 %v1710_v15, %v1489_v38 }
 0x10b   :  { %1140 = vtanh.f32 %v426_v32  ;;  %v905_v47 = vadd.f32 %v904_v24, %v903_v13  ;;  %v534_v5 = vmul.f32 %v1125_v52, %v501_v42  ;;  %v882_v38 = vmul.f32 %v1127_v27, %v501_v42 }
 0x10c   :  { %1142 = vtanh.f32 %v854_v31  ;;  %960 = vst.msk [vmem:[%s1822_s5 + $0xf0] sm:$0xff] %vm298_vm0, %v717_v57  ;;  %v853_v54 = vadd.f32 %v1715_v44, %v717_v57  ;;  %v506_v21 = vpop.permute.xlu0 %505  ;;  %s1173_s5 = smov [#allocation2]  }
 0x10d   :  { %v1129_v28 = vpop.eup %1128  ;;  %1144 = vtanh.f32 %v425_v53  ;;  %v560_v29 = vsel %vm298_vm0, %v534_v5, 0.0  ;;  %v908_v7 = vsel %vm298_vm0, %v882_v38, 0.0  ;;  %v521_v8 = vpop.permute.xlu1 %520  ;;  %s933_s11 = sshll.u32 %s1173_s5, 4  ;;  %s934_s11 = int_to_ptr.vmem [resolvable:$true] %s933_s11 }
 0x10e   :  { %v533_v43 = vmul.f32 %v1129_v28, %v496_v56  ;;  %1146 = vtanh.f32 %v853_v54  ;;  %s1148_s12 = scalar_lea.vmem %s934_s11, 32  ;;  %p1153_p1 = scmp.lt.s32.totalorder %s934_s11, %s934_s11 }
 0x10f   :  { %v1131_v49 = vpop.eup %1130  ;;  %p1149_p0 = scmp.ne.s32.totalorder %s934_s11, %s1148_s12  ;;  %p1154_p2 = scmp.lt.s32.totalorder %s1148_s12, %s1148_s12 }
 0x110   :  { %v558_v18 = vsel %vm298_vm0, %v533_v43, 0.0  ;;  %v881_v4 = vmul.f32 %v1131_v49, %v496_v56  ;;  %v516_v9 = vpop.permute.xlu0 %515 }
 0x111   :  { %v1133_v19 = vpop.eup %1132  ;;  %v559_v15 = vadd.f32 %v558_v18, %v557_v25  ;;  %p1155_p3 = por %p1154_p2, %p1153_p1 }
 0x112   :  { %v1135_v59 = vpop.eup %1134  ;;  %v906_v26 = vsel %vm298_vm0, %v881_v4, 0.0  ;;  %v536_v45 = vmul.f32 %v1133_v19, %v511_v20 }
 0x113   :  { %v1137_v12 = vpop.eup %1136  ;;  %v561_v30 = vadd.f32 %v560_v29, %v559_v15  ;;  %v907_v39 = vadd.f32 %v906_v26, %v905_v47  ;;  %v884_v58 = vmul.f32 %v1135_v59, %v511_v20  ;;  %p1156_p4 = pnand %p1155_p3, %p1149_p0 }
 0x114   :  { %v1139_v44 = vpop.eup %1138  ;;  %v535_v3 = vmul.f32 %v1137_v12, %v506_v21  ;;  %v564_v10 = vsel %vm298_vm0, %v536_v45, 0.0 }
 0x115   :  { %v1141_v1 = vpop.eup %1140  ;;  %v883_v55 = vmul.f32 %v1139_v44, %v506_v21  ;;  %v909_v48 = vadd.f32 %v908_v7, %v907_v39  ;;  %v912_v35 = vsel %vm298_vm0, %v884_v58, 0.0 }
 0x116   :  { %v1143_v14 = vpop.eup %1142  ;;  %v562_v16 = vsel %vm298_vm0, %v535_v3, 0.0  ;;  %v538_v50 = vmul.f32 %v1141_v1, %v521_v8 }
 0x117   :  { %v1145_v33 = vpop.eup %1144  ;;  %v563_v23 = vadd.f32 %v562_v16, %v561_v30  ;;  %v910_v41 = vsel %vm298_vm0, %v883_v55, 0.0  ;;  %v886_v6 = vmul.f32 %v1143_v14, %v521_v8 }
 0x118   :  { %v911_v61 = vadd.f32 %v910_v41, %v909_v48  ;;  %v537_v34 = vmul.f32 %v1145_v33, %v516_v9  ;;  %v1147_v62 = vpop.eup %1146  ;;  %v568_v11 = vsel %vm298_vm0, %v538_v50, 0.0 }
 0x119   :  { %v565_v0 = vadd.f32 %v564_v10, %v563_v23  ;;  %v885_v17 = vmul.f32 %v1147_v62, %v516_v9  ;;  %v916_v37 = vsel %vm298_vm0, %v886_v6, 0.0 }
 0x11a   :  { %v566_v40 = vsel %vm298_vm0, %v537_v34, 0.0  ;;  %v913_v60 = vadd.f32 %v912_v35, %v911_v61 }
 0x11b   :  { %v567_v51 = vadd.f32 %v566_v40, %v565_v0  ;;  %v914_v63 = vsel %vm298_vm0, %v885_v17, 0.0 }
 0x11c   :  { %v915_v36 = vadd.f32 %v914_v63, %v913_v60 }
 0x11d   :  { %v569_v2 = vadd.f32 %v568_v11, %v567_v51 }
 0x11e   :  { %v917_v32 = vadd.f32 %v916_v37, %v915_v36 }
 0x11f   :  { %v570_v22 = vrot.slane %v569_v2, 4 }
 0x120   :  { %v918_v25 = vrot.slane %v917_v32, 4 }
 0x121   :  { %v571_v52 = vadd.f32 %v570_v22, %v569_v2 }
 0x122   :  { %v919_v31 = vadd.f32 %v918_v25, %v917_v32 }
 0x123   :  { %v572_v46 = vrot.slane %v571_v52, 2 }
 0x124   :  { %v920_v53 = vrot.slane %v919_v31, 2 }
 0x125   :  { %v573_v13 = vadd.f32 %v572_v46, %v571_v52 }
 0x126   :  { %v921_v42 = vadd.f32 %v920_v53, %v919_v31 }
 0x127   :  { %v574_v24 = vrot.slane %v573_v13, 1 }
 0x128   :  { %v922_v56 = vrot.slane %v921_v42, 1 }
 0x129   :  { %v575_v57 = vadd.f32 %v574_v24, %v573_v13 }
 0x12a   :  { %v923_v27 = vadd.f32 %v922_v56, %v921_v42 }
 0x12b   :  { %577 = vst.msk [vmem:[#allocation2] sm:$0x1] %vm576_vm1, %v575_v57 }
 0x12c   :  { %925 = vst.msk [vmem:[#allocation2 + $0x1] sm:$0x1] %vm576_vm1, %v923_v27 }
 0x12d   :  { %1159 = shalt.err (!%p1156_p4)
}
 0x12e   :  { %s1160_s3 = scalar_lea.hbm %s1823_s6, 32 }
 0x12f   :  { %p1161_p5 = scmp.ne.s32.totalorder %s1823_s6, %s1160_s3  ;;  %p1164_p6 = scmp.lt.u32.totalorder %s1160_s3, %s1823_s6 }
 0x131   :  { %p1166_p7 = pnand %p1164_p6, %p1161_p5 }
 0x133   :  { %1169 = shalt.err (!%p1166_p7)
}
 0x134   :  { %s1174_s18 = smov 16   ;;  %s1175_s19 = smov 1  }
 0x135   :  { %939 = dma.vmem_to_hbm [thread:$0]  %s934_s11, 32, %s1823_s6, [#allocation3], %s1174_s18, %s1174_s18, %s1175_s19  }
 0x136   :  { %1170 = dma.done.wait [#allocation3], 32  }
 0x137   :  { %1171 = vsyncadd [#allocation3], 4294967264 }
 0x138   :  { %945 = vsyncpa [#allocation3], 1 }

</bundles_post_ra>
